<compile_context>
chip_gen: v7x
topology: tpu7x:2x2x1
jax: 0.10.0
libtpu: 0.0.40
codegen_flags: <defaults>
</compile_context>

<pallas_src>
import functools

import jax
import jax.numpy as jnp
from jax.experimental import pallas as pl
from jax.experimental.pallas import tpu as pltpu


# ----------------------------------------------------------------------------
# Fused kernel, one batch tile per grid step:
#   [3 partial fusion matmuls -> relu -> classifier matmul
#    -> masked softmax -> gather label prob -> log(p+eps) -> per-tile NLL sum]
# ----------------------------------------------------------------------------
def fused_vqa_loss_kernel(img_ref, d3_ref, q_ref, labels_ref,
                          w_img_ref, w_d3_ref, w_q_ref, b1_ref,
                          wc_ref, bc_ref,
                          nll_ref, *, n_cls, eps):
    # Cast features to bf16 in VMEM (MXU operands); accumulate in f32.
    img = img_ref[...].astype(jnp.bfloat16)          # [bt, F_img]
    d3 = d3_ref[...].astype(jnp.bfloat16)            # [bt, F_d3]
    qf = q_ref[...].astype(jnp.bfloat16)             # [bt, S*Dq] (mean folded into w_q)

    # hidden = relu(img @ Wi + d3 @ Wd + q @ Wq + b1)  -- one f32 accumulator.
    h = (jnp.dot(img, w_img_ref[...], preferred_element_type=jnp.float32)
         + jnp.dot(d3, w_d3_ref[...], preferred_element_type=jnp.float32)
         + jnp.dot(qf, w_q_ref[...], preferred_element_type=jnp.float32)
         + b1_ref[...])
    h = jnp.maximum(h, 0.0)

    # logits = h @ Wc + bc   (logits never leave VMEM)
    logits = jnp.dot(h.astype(jnp.bfloat16), wc_ref[...],
                     preferred_element_type=jnp.float32) + bc_ref[...]

    bt, c_pad = logits.shape
    cls_ids = jax.lax.broadcasted_iota(jnp.int32, (bt, c_pad), 1)

    # Mask padded class columns so the softmax is exactly over n_cls classes.
    logits = jnp.where(cls_ids < n_cls, logits, jnp.float32(-1e30))

    # Numerically stable softmax pieces.
    m = jnp.max(logits, axis=1, keepdims=True)
    e = jnp.exp(logits - m)
    denom = jnp.sum(e, axis=1, keepdims=True)

    # Gather first, log once: only the label column is ever used.
    labels = labels_ref[...]                                     # [bt, 1] int32
    picked_e = jnp.sum(jnp.where(cls_ids == labels, e, 0.0),
                       axis=1, keepdims=True)                    # [bt, 1]
    picked_p = picked_e * pl.reciprocal(denom, approx=True)      # softmax[label]
    logp_picked = jnp.log(picked_p + eps)                        # keep +eps semantics

    # Per-tile partial NLL sum -> lane-dense output block (no (B,1) writeback).
    tile_nll = -jnp.sum(logp_picked)                             # scalar f32
    nll_ref[...] = jnp.broadcast_to(tile_nll, nll_ref.shape)


# ----------------------------------------------------------------------------
# Wrapper: one fused pallas_call, gridded over batch tiles.
# ----------------------------------------------------------------------------
def vqa_step_loss(batch_image_patches, d3_patches, questions, labels, params,
                  *, n_cls, eps, b_tile=256):
    """Returns step_loss = nll_loss(log(softmax(logits, dim=1) + eps), labels)."""
    w_img, w_d3, w_q, b1, wc, bc = params
    B = batch_image_patches.shape[0]
    assert B % b_tile == 0, "batch must be a multiple of the tile size"
    num_tiles = B // b_tile

    # Free minor-dim collapses (no HBM round-trip under jit); all real math
    # (cast, mean-pool-via-weight, matmuls, softmax, NLL) happens in-kernel.
    img = batch_image_patches.reshape(B, -1)          # [B, F_img] f32
    d3f = d3_patches.reshape(B, -1)                    # [B, F_d3]  f32
    qf = questions.reshape(B, -1)                      # [B, S*Dq]  f32
    labels2d = labels.astype(jnp.int32).reshape(B, 1)  # [B, 1]

    f_img = img.shape[1]
    f_d3 = d3f.shape[1]
    f_q = qf.shape[1]
    hid = wc.shape[0]
    c_pad = wc.shape[1]

    nll_tiles = pl.pallas_call(
        functools.partial(fused_vqa_loss_kernel, n_cls=n_cls, eps=eps),
        out_shape=jax.ShapeDtypeStruct((num_tiles, 8, 128), jnp.float32),
        grid_spec=pltpu.PrefetchScalarGridSpec(
            num_scalar_prefetch=0,
            grid=(num_tiles,),
            in_specs=[
                pl.BlockSpec((b_tile, f_img), lambda i: (i, 0)),   # image feats
                pl.BlockSpec((b_tile, f_d3), lambda i: (i, 0)),    # 3d feats
                pl.BlockSpec((b_tile, f_q), lambda i: (i, 0)),     # question tokens
                pl.BlockSpec((b_tile, 1), lambda i: (i, 0)),       # labels
                pl.BlockSpec((f_img, hid), lambda i: (0, 0)),      # W_img (resident)
                pl.BlockSpec((f_d3, hid), lambda i: (0, 0)),       # W_d3  (resident)
                pl.BlockSpec((f_q, hid), lambda i: (0, 0)),        # W_q   (resident)
                pl.BlockSpec((1, hid), lambda i: (0, 0)),          # b1
                pl.BlockSpec((hid, c_pad), lambda i: (0, 0)),      # Wc    (resident)
                pl.BlockSpec((1, c_pad), lambda i: (0, 0)),        # bc
            ],
            out_specs=pl.BlockSpec((1, 8, 128), lambda i: (i, 0, 0)),
        ),
        compiler_params=pltpu.CompilerParams(
            dimension_semantics=("parallel",)),   # >=2 tiles -> both TCs on v7x
    )(img, d3f, qf, labels2d, w_img, w_d3, w_q, b1, wc, bc)

    # Per-tile partial sums -> scalar mean (nll_loss default reduction).
    return jnp.sum(nll_tiles[:, 0, 0]) / B


# ----------------------------------------------------------------------------
# Stand-in model parameters (dense fusion + classifier head).
# ----------------------------------------------------------------------------
def init_params(key, f_img, f_d3, s_tokens, d_q, hidden, c_pad):
    ks = jax.random.split(key, 6)
    s = 0.02
    w_img = (s * jax.random.normal(ks[0], (f_img, hidden), jnp.float32)
             ).astype(jnp.bfloat16)
    w_d3 = (s * jax.random.normal(ks[1], (f_d3, hidden), jnp.float32)
            ).astype(jnp.bfloat16)
    # Question token mean-pool folded into a stacked weight acting on the
    # flattened [S*Dq] token features: q_mean @ W == q_flat @ tile(W, S)/S.
    w_q_tok = s * jax.random.normal(ks[2], (d_q, hidden), jnp.float32)
    w_q = (jnp.tile(w_q_tok, (s_tokens, 1)) / s_tokens).astype(jnp.bfloat16)
    b1 = s * jax.random.normal(ks[3], (1, hidden), jnp.float32)
    wc = (s * jax.random.normal(ks[4], (hidden, c_pad), jnp.float32)
          ).astype(jnp.bfloat16)
    bc = s * jax.random.normal(ks[5], (1, c_pad), jnp.float32)
    return (w_img, w_d3, w_q, b1, wc, bc)


# ----------------------------------------------------------------------------
# Main
# ----------------------------------------------------------------------------
if __name__ == "__main__":
    key = jax.random.PRNGKey(0)
    k_img, k_d3, k_q, k_lbl, k_par = jax.random.split(key, 5)

    # Small stand-in shapes (original batch_size is 3072; real class count
    # ~3000).  Lane dims chosen/padded to 128 per the perf review.
    B = 512        # mini-batch (stands in for self.batch_size slices)
    B_TILE = 256   # batch tile per grid step -> grid = 2 (keeps both v7x TCs busy)
    P = 4          # image / d3 patches per example
    D_IMG = 16     # per-patch image feature dim
    D_3 = 8        # per-patch 3D-coordinate feature dim
    S = 8          # question token length
    D_Q = 16       # question token embedding dim (BERT stand-in)
    HID = 128      # fusion hidden dim (128-aligned)
    N_CLS = 16     # real number of answer classes
    C_PAD = 128    # padded class dim (lane-aligned; padded cols masked)
    EPS = 1e-4

    batch_image_patches = jax.random.normal(k_img, (B, P, D_IMG), jnp.float32)
    d3_patches = jax.random.normal(k_d3, (B, P, D_3), jnp.float32)
    # TODO(synk): `questions` are raw strings fed to BERT in the original;
    #             here they are pre-embedded token vectors.
    questions = jax.random.normal(k_q, (B, S, D_Q), jnp.float32)
    labels = jax.random.randint(k_lbl, (B,), 0, N_CLS, jnp.int32)

    params = init_params(k_par, P * D_IMG, P * D_3, S, D_Q, HID, C_PAD)

    step_fn = jax.jit(functools.partial(
        vqa_step_loss, n_cls=N_CLS, eps=EPS, b_tile=B_TILE))
    loss = step_fn(batch_image_patches, d3_patches, questions, labels, params)
    loss = jax.block_until_ready(loss)

    # ---------------- pure-JAX reference of the same math ----------------
    w_img, w_d3, w_q, b1, wc, bc = params
    img_bf = batch_image_patches.reshape(B, -1).astype(jnp.bfloat16)
    d3_bf = d3_patches.reshape(B, -1).astype(jnp.bfloat16)
    q_bf = questions.reshape(B, -1).astype(jnp.bfloat16)
    h_ref = jnp.maximum(
        jnp.dot(img_bf, w_img, preferred_element_type=jnp.float32)
        + jnp.dot(d3_bf, w_d3, preferred_element_type=jnp.float32)
        + jnp.dot(q_bf, w_q, preferred_element_type=jnp.float32)
        + b1, 0.0)
    logits_ref = jnp.dot(h_ref.astype(jnp.bfloat16), wc,
                         preferred_element_type=jnp.float32) + bc
    logits_ref = jnp.where(jnp.arange(C_PAD)[None, :] < N_CLS,
                           logits_ref, jnp.float32(-1e30))
    p_ref = jax.nn.softmax(logits_ref, axis=1)
    logp_ref = jnp.log(p_ref + EPS)
    loss_ref = -jnp.mean(logp_ref[jnp.arange(B), labels])

    # Tolerance loosened slightly for the approx (EUP) reciprocal path.
    assert jnp.allclose(loss, loss_ref, atol=2e-3, rtol=2e-3), (loss, loss_ref)

    print("KERNEL_OK")
</pallas_src>

<mosaic_0001>
module attributes {stable_mosaic.version = 11 : i64} {
  func.func @fused_vqa_loss_kernel(%arg0: i32, %arg1: memref<256x64xf32, #tpu.memory_space<vmem>>, %arg2: memref<256x32xf32, #tpu.memory_space<vmem>>, %arg3: memref<256x128xf32, #tpu.memory_space<vmem>>, %arg4: memref<256x1xi32, #tpu.memory_space<vmem>>, %arg5: memref<64x128xbf16, #tpu.memory_space<vmem>>, %arg6: memref<32x128xbf16, #tpu.memory_space<vmem>>, %arg7: memref<128x128xbf16, #tpu.memory_space<vmem>>, %arg8: memref<1x128xf32, #tpu.memory_space<vmem>>, %arg9: memref<128x128xbf16, #tpu.memory_space<vmem>>, %arg10: memref<1x128xf32, #tpu.memory_space<vmem>>, %arg11: memref<1x8x128xf32, #tpu.memory_space<vmem>>) attributes {dimension_semantics = [#tpu.dimension_semantics<parallel>], iteration_bounds = array<i64: 2>, scalar_prefetch = 0 : i64, scratch_operands = 0 : i64, tpu.core_type = #tpu.core_type<tc>, window_params = [{transform_indices = @transform_0, window_bounds = array<i64: 256, 64>}, {transform_indices = @transform_1, window_bounds = array<i64: 256, 32>}, {transform_indices = @transform_2, window_bounds = array<i64: 256, 128>}, {transform_indices = @transform_3, window_bounds = array<i64: 256, 1>}, {pipeline_mode = #tpu.pipeline_mode<synchronous>, transform_indices = @transform_4, window_bounds = array<i64: 64, 128>}, {pipeline_mode = #tpu.pipeline_mode<synchronous>, transform_indices = @transform_5, window_bounds = array<i64: 32, 128>}, {pipeline_mode = #tpu.pipeline_mode<synchronous>, transform_indices = @transform_6, window_bounds = array<i64: 128, 128>}, {pipeline_mode = #tpu.pipeline_mode<synchronous>, transform_indices = @transform_7, window_bounds = array<i64: 1, 128>}, {pipeline_mode = #tpu.pipeline_mode<synchronous>, transform_indices = @transform_8, window_bounds = array<i64: 128, 128>}, {pipeline_mode = #tpu.pipeline_mode<synchronous>, transform_indices = @transform_9, window_bounds = array<i64: 1, 128>}, {transform_indices = @transform_10, window_bounds = array<i64: 1, 8, 128>}]} {
    %c0 = arith.constant 0 : index
    %c0_0 = arith.constant 0 : index
    %0 = vector.load %arg1[%c0, %c0_0] : memref<256x64xf32, #tpu.memory_space<vmem>>, vector<256x64xf32>
    %1 = arith.truncf %0 : vector<256x64xf32> to vector<256x64xbf16>
    %c0_1 = arith.constant 0 : index
    %c0_2 = arith.constant 0 : index
    %2 = vector.load %arg2[%c0_1, %c0_2] : memref<256x32xf32, #tpu.memory_space<vmem>>, vector<256x32xf32>
    %3 = arith.truncf %2 : vector<256x32xf32> to vector<256x32xbf16>
    %c0_3 = arith.constant 0 : index
    %c0_4 = arith.constant 0 : index
    %4 = vector.load %arg3[%c0_3, %c0_4] : memref<256x128xf32, #tpu.memory_space<vmem>>, vector<256x128xf32>
    %5 = arith.truncf %4 : vector<256x128xf32> to vector<256x128xbf16>
    %c0_5 = arith.constant 0 : index
    %c0_6 = arith.constant 0 : index
    %6 = vector.load %arg5[%c0_5, %c0_6] : memref<64x128xbf16, #tpu.memory_space<vmem>>, vector<64x128xbf16>
    %cst = arith.constant dense<0.000000e+00> : vector<256x128xf32>
    %7 = tpu.matmul %1, %6, %cst {dimension_numbers = #tpu.dot_dimension_numbers<[1], [0], [0], [1], [0, 0, 1, 1], [], []>} : vector<256x64xbf16>, vector<64x128xbf16>, vector<256x128xf32> -> vector<256x128xf32>
    %c0_7 = arith.constant 0 : index
    %c0_8 = arith.constant 0 : index
    %8 = vector.load %arg6[%c0_7, %c0_8] : memref<32x128xbf16, #tpu.memory_space<vmem>>, vector<32x128xbf16>
    %cst_9 = arith.constant dense<0.000000e+00> : vector<256x128xf32>
    %9 = tpu.matmul %3, %8, %cst_9 {dimension_numbers = #tpu.dot_dimension_numbers<[1], [0], [0], [1], [0, 0, 1, 1], [], []>} : vector<256x32xbf16>, vector<32x128xbf16>, vector<256x128xf32> -> vector<256x128xf32>
    %10 = arith.addf %7, %9 : vector<256x128xf32>
    %c0_10 = arith.constant 0 : index
    %c0_11 = arith.constant 0 : index
    %11 = vector.load %arg7[%c0_10, %c0_11] : memref<128x128xbf16, #tpu.memory_space<vmem>>, vector<128x128xbf16>
    %cst_12 = arith.constant dense<0.000000e+00> : vector<256x128xf32>
    %12 = tpu.matmul %5, %11, %cst_12 {dimension_numbers = #tpu.dot_dimension_numbers<[1], [0], [0], [1], [0, 0, 1, 1], [], []>} : vector<256x128xbf16>, vector<128x128xbf16>, vector<256x128xf32> -> vector<256x128xf32>
    %13 = arith.addf %10, %12 : vector<256x128xf32>
    %c0_13 = arith.constant 0 : index
    %c0_14 = arith.constant 0 : index
    %14 = vector.load %arg8[%c0_13, %c0_14] : memref<1x128xf32, #tpu.memory_space<vmem>>, vector<1x128xf32>
    %15 = vector.broadcast %14 : vector<1x128xf32> to vector<256x128xf32>
    %16 = arith.addf %13, %15 : vector<256x128xf32>
    %cst_15 = arith.constant 0.000000e+00 : f32
    %17 = vector.broadcast %cst_15 : f32 to vector<256x128xf32>
    %18 = arith.maximumf %16, %17 : vector<256x128xf32>
    %19 = arith.truncf %18 : vector<256x128xf32> to vector<256x128xbf16>
    %c0_16 = arith.constant 0 : index
    %c0_17 = arith.constant 0 : index
    %20 = vector.load %arg9[%c0_16, %c0_17] : memref<128x128xbf16, #tpu.memory_space<vmem>>, vector<128x128xbf16>
    %cst_18 = arith.constant dense<0.000000e+00> : vector<256x128xf32>
    %21 = tpu.matmul %19, %20, %cst_18 {dimension_numbers = #tpu.dot_dimension_numbers<[1], [0], [0], [1], [0, 0, 1, 1], [], []>} : vector<256x128xbf16>, vector<128x128xbf16>, vector<256x128xf32> -> vector<256x128xf32>
    %c0_19 = arith.constant 0 : index
    %c0_20 = arith.constant 0 : index
    %22 = vector.load %arg10[%c0_19, %c0_20] : memref<1x128xf32, #tpu.memory_space<vmem>>, vector<1x128xf32>
    %23 = vector.broadcast %22 : vector<1x128xf32> to vector<256x128xf32>
    %24 = arith.addf %21, %23 : vector<256x128xf32>
    %25 = tpu.iota {dimensions = array<i32: 1>} : vector<256x128xi32>
    %c16_i32 = arith.constant 16 : i32
    %26 = vector.broadcast %c16_i32 : i32 to vector<256x128xi32>
    %27 = arith.cmpi slt, %25, %26 : vector<256x128xi32>
    %cst_21 = arith.constant -1.000000e+30 : f32
    %28 = vector.broadcast %cst_21 : f32 to vector<256x128xf32>
    %29 = arith.select %27, %24, %28 : vector<256x128xi1>, vector<256x128xf32>
    %cst_22 = arith.constant dense<0xFF800000> : vector<256xf32>
    %30 = vector.multi_reduction <maximumf>, %29, %cst_22 [1] : vector<256x128xf32> to vector<256xf32>
    %31 = vector.shape_cast %30 : vector<256xf32> to vector<256x1xf32>
    %32 = vector.broadcast %31 : vector<256x1xf32> to vector<256x128xf32>
    %33 = arith.subf %29, %32 : vector<256x128xf32>
    %34 = math.exp %33 : vector<256x128xf32>
    %cst_23 = arith.constant dense<0.000000e+00> : vector<256xf32>
    %35 = vector.multi_reduction <add>, %34, %cst_23 [1] : vector<256x128xf32> to vector<256xf32>
    %36 = vector.shape_cast %35 : vector<256xf32> to vector<256x1xf32>
    %c0_24 = arith.constant 0 : index
    %c0_25 = arith.constant 0 : index
    %37 = vector.load %arg4[%c0_24, %c0_25] : memref<256x1xi32, #tpu.memory_space<vmem>>, vector<256x1xi32>
    %38 = vector.broadcast %37 : vector<256x1xi32> to vector<256x128xi32>
    %39 = arith.cmpi eq, %25, %38 : vector<256x128xi32>
    %cst_26 = arith.constant 0.000000e+00 : f32
    %40 = vector.broadcast %cst_26 : f32 to vector<256x128xf32>
    %41 = arith.select %39, %34, %40 : vector<256x128xi1>, vector<256x128xf32>
    %cst_27 = arith.constant dense<0.000000e+00> : vector<256xf32>
    %42 = vector.multi_reduction <add>, %41, %cst_27 [1] : vector<256x128xf32> to vector<256xf32>
    %43 = vector.shape_cast %42 : vector<256xf32> to vector<256x1xf32>
    %44 = tpu.reciprocal %36 {approx = true} : vector<256x1xf32> -> vector<256x1xf32>
    %45 = arith.mulf %43, %44 : vector<256x1xf32>
    %cst_28 = arith.constant 9.99999974E-5 : f32
    %46 = vector.broadcast %cst_28 : f32 to vector<256x1xf32>
    %47 = arith.addf %45, %46 : vector<256x1xf32>
    %48 = math.log %47 : vector<256x1xf32>
    %49 = vector.shape_cast %48 : vector<256x1xf32> to vector<1x256x1xf32>
    %cst_29 = arith.constant dense<0.000000e+00> : vector<1xf32>
    %50 = vector.multi_reduction <add>, %49, %cst_29 [1, 2] : vector<1x256x1xf32> to vector<1xf32>
    %51 = vector.shape_cast %50 : vector<1xf32> to vector<1x1x1xf32>
    %52 = vector.extract %51[0, 0, 0] : f32 from vector<1x1x1xf32>
    %cst_30 = arith.constant 0.000000e+00 : f32
    %53 = arith.subf %cst_30, %52 : f32
    %54 = vector.broadcast %53 : f32 to vector<1x8x128xf32>
    %c0_31 = arith.constant 0 : index
    %c0_32 = arith.constant 0 : index
    %c0_33 = arith.constant 0 : index
    %55 = vector.load %arg11[%c0_31, %c0_32, %c0_33] : memref<1x8x128xf32, #tpu.memory_space<vmem>>, vector<1x8x128xf32>
    tpu.vector_store %arg11[%c0_31, %c0_32, %c0_33], %54 {strides = array<i32>} : memref<1x8x128xf32, #tpu.memory_space<vmem>>, vector<1x8x128xf32>,
    return
  }
  func.func @transform_0(%arg0: i32) -> (i32, i32) {
    %c0_i32 = arith.constant 0 : i32
    %c0_i32_0 = arith.constant 0 : i32
    return %arg0, %c0_i32 : i32, i32
  }
  func.func @transform_1(%arg0: i32) -> (i32, i32) {
    %c0_i32 = arith.constant 0 : i32
    %c0_i32_0 = arith.constant 0 : i32
    return %arg0, %c0_i32 : i32, i32
  }
  func.func @transform_2(%arg0: i32) -> (i32, i32) {
    %c0_i32 = arith.constant 0 : i32
    %c0_i32_0 = arith.constant 0 : i32
    return %arg0, %c0_i32 : i32, i32
  }
  func.func @transform_3(%arg0: i32) -> (i32, i32) {
    %c0_i32 = arith.constant 0 : i32
    %c0_i32_0 = arith.constant 0 : i32
    return %arg0, %c0_i32 : i32, i32
  }
  func.func @transform_4(%arg0: i32) -> (i32, i32) {
    %c0_i32 = arith.constant 0 : i32
    %c0_i32_0 = arith.constant 0 : i32
    %c0_i32_1 = arith.constant 0 : i32
    return %c0_i32, %c0_i32_0 : i32, i32
  }
  func.func @transform_5(%arg0: i32) -> (i32, i32) {
    %c0_i32 = arith.constant 0 : i32
    %c0_i32_0 = arith.constant 0 : i32
    %c0_i32_1 = arith.constant 0 : i32
    return %c0_i32, %c0_i32_0 : i32, i32
  }
  func.func @transform_6(%arg0: i32) -> (i32, i32) {
    %c0_i32 = arith.constant 0 : i32
    %c0_i32_0 = arith.constant 0 : i32
    %c0_i32_1 = arith.constant 0 : i32
    return %c0_i32, %c0_i32_0 : i32, i32
  }
  func.func @transform_7(%arg0: i32) -> (i32, i32) {
    %c0_i32 = arith.constant 0 : i32
    %c0_i32_0 = arith.constant 0 : i32
    %c0_i32_1 = arith.constant 0 : i32
    return %c0_i32, %c0_i32_0 : i32, i32
  }
  func.func @transform_8(%arg0: i32) -> (i32, i32) {
    %c0_i32 = arith.constant 0 : i32
    %c0_i32_0 = arith.constant 0 : i32
    %c0_i32_1 = arith.constant 0 : i32
    return %c0_i32, %c0_i32_0 : i32, i32
  }
  func.func @transform_9(%arg0: i32) -> (i32, i32) {
    %c0_i32 = arith.constant 0 : i32
    %c0_i32_0 = arith.constant 0 : i32
    %c0_i32_1 = arith.constant 0 : i32
    return %c0_i32, %c0_i32_0 : i32, i32
  }
  func.func @transform_10(%arg0: i32) -> (i32, i32, i32) {
    %c0_i32 = arith.constant 0 : i32
    %c0_i32_0 = arith.constant 0 : i32
    %c0_i32_1 = arith.constant 0 : i32
    return %arg0, %c0_i32, %c0_i32_0 : i32, i32, i32
  }
}

</mosaic_0001>

<bundles_post_ra>
// kernel: vqa_step_loss.1
= control target key start
LH: loop header
LB: loop body
LE: loop exit
PB: predicated region body
PF: predicated region fallthrough
CT: control target
= control target key end

     0   :  { %s3140_s13 = smov 0   ;;  %s3945_s0 = inlined_call_operand.vmem [shape: f32[512,64], index: 0, kind: input, shape index: {}]   ;;  %s3946_s1 = inlined_call_operand.vmem [shape: f32[512,32], index: 1, kind: input, shape index: {}]   ;;  %s3947_s2 = inlined_call_operand.vmem [shape: f32[512,128], index: 2, kind: input, shape index: {}]   ;;  %s3948_s3 = inlined_call_operand.vmem [shape: s32[512,1], index: 3, kind: input, shape index: {}]   ;;  %s3949_s4 = inlined_call_operand.vmem [shape: bf16[64,128], index: 4, kind: input, shape index: {}]   ;;  %s3950_s5 = inlined_call_operand.vmem [shape: bf16[32,128], index: 5, kind: input, shape index: {}]   ;;  %s3951_s6 = inlined_call_operand.vmem [shape: bf16[128,128], index: 6, kind: input, shape index: {}]   ;;  %s3952_s7 = inlined_call_operand.vmem [shape: f32[1,128], index: 7, kind: input, shape index: {}]   ;;  %s3953_s8 = inlined_call_operand.vmem [shape: bf16[128,128], index: 8, kind: input, shape index: {}]   ;;  %s3954_s9 = inlined_call_operand.vmem [shape: f32[1,128], index: 9, kind: input, shape index: {}]   ;;  %s3955_s10 = inlined_call_operand.vmem [shape: f32[2,8,128], index: 10, kind: output, shape index: {}]  }
   0x1 LB: > { %s3146_s14 = sadd.s32 4294967295, %s3082_s13   ;;  %p2459_p0 = scmp.ge.s32.totalorder %s3082_s13, 1  ;;  %s3082_s13 = sphi %s3140_s13, %s20_s13  }
   0x2   : > { %p346_p1 = scmp.lt.s32.totalorder %s3082_s13, 3 }
   0x4   : > { %p347_p2 = pnand %p2459_p0, %p346_p1 }
   0x6   : > { %350 = sbr.rel (%p347_p2) target bundleno = 1193 (0x4a9), region = 60 }
   0xd   : > { %v2862_v0 = vld [vmem:[%s3949_s4] sm:$0xff]   ;;  %s2460_s17 = sshll.u32 %s3146_s14, 5  ;;  %v2863_v1 = vld [vmem:[%s3949_s4 + $0x8] sm:$0xff]   ;;  %v2864_v2 = vld [vmem:[%s3949_s4 + $0x10] sm:$0xff]   ;;  %vm829_vm0 = vcmask 523264   ;;  %vm595_vm1 = vcmask 261120  }
   0xe   : > { %p399_p3 = scmp.lt.s32.totalorder %s2460_s17, 63  ;;  %2649 = vmatprep.subr.bf16.mxu0 %v2862_v0  ;;  %v2865_v5 = vld [vmem:[%s3949_s4 + $0x18] sm:$0xff]   ;;  %v2866_v7 = vld [vmem:[%s3951_s6] sm:$0xff]   ;;  %v2867_v14 = vld [vmem:[%s3951_s6 + $0x8] sm:$0xff]   ;;  %p422_p4 = scmp.lt.s32.totalorder %s3146_s14, 1 }
   0xf   : > { %2650 = vmatpush3.bf16.msra.mxu0 %v2862_v0  ;;  %v2868_v17 = vld [vmem:[%s3951_s6 + $0x10] sm:$0xff]   ;;  %v2873_v20 = vld [vmem:[%s3950_s5] sm:$0xff]   ;;  %v2869_v23 = vld [vmem:[%s3951_s6 + $0x18] sm:$0xff]  }
  0x10   : > { %s3993_s17 = smov (!%p399_p3, %s2460_s17), 63  ;;  %2651 = vmatprep.subr.bf16.mxu0 %v2863_v1  ;;  %2613 = vmatprep.subr.bf16.mxu1 %v2873_v20  ;;  %v2875_v24 = vld [vmem:[%s3950_s5 + $0x8] sm:$0xff]   ;;  %v2870_v37 = vld [vmem:[%s3951_s6 + $0x20] sm:$0xff]   ;;  %v2872_v51 = vld [vmem:[%s3951_s6 + $0x30] sm:$0xff]   ;;  %s3995_s14 = smov (!%p422_p4, %s3146_s14), 1 }
  0x11   : > { %s3160_s22 = sshll.u32 %s3993_s17, 3  ;;  %2614 = vmatpush3.bf16.msra.mxu1 %v2873_v20  ;;  %v2871_v41 = vld [vmem:[%s3951_s6 + $0x28] sm:$0xff]   ;;  %v2874_v55 = vld [vmem:[%s3951_s6 + $0x38] sm:$0xff]   ;;  %s2468_s28 = sshll.u32 %s3995_s14, 3 }
  0x12   : > { %s3166_s25 = scalar_lea.vmem %s3945_s0, %s3160_s22  ;;  %s3200_s20 = scalar_lea.vmem %s3946_s1, %s3160_s22  ;;  %2615 = vmatprep.subr.bf16.mxu1 %v2875_v24 }
  0x13   : > { %2652 = vmatpush3.bf16.msra.mxu0 %v2863_v1  ;;  %v427_v3 = vld [vmem:[%s3166_s25] sm:$0xff]  ;;  %v428_v4 = vld [vmem:[%s3166_s25 + $0x8] sm:$0xff]  ;;  %v429_v8 = vld [vmem:[%s3166_s25 + $0x10] sm:$0xff]  ;;  %s3307_s16 = scalar_lea.vmem %s3947_s2, %s3160_s22  ;;  %s3369_s23 = scalar_lea.vmem %s3948_s3, %s3160_s22 }
  0x14   : > { %2653 = vmatprep.subr.bf16.mxu0 %v2864_v2  ;;  %v459_v6 = vpack.c.bf16 %v428_v4, %v427_v3  ;;  %v430_v9 = vld [vmem:[%s3166_s25 + $0x18] sm:$0xff]  ;;  %v431_v10 = vld [vmem:[%s3166_s25 + $0x20] sm:$0xff]  ;;  %v432_v11 = vld [vmem:[%s3166_s25 + $0x28] sm:$0xff]  ;;  %s425_s12 = scalar_lea.vmem %s3955_s10, %s2468_s28 }
  0x15   : > { %v460_v12 = vpack.c.bf16 %v430_v9, %v429_v8  ;;  %v461_v13 = vpack.c.bf16 %v432_v11, %v431_v10  ;;  %v433_v15 = vld [vmem:[%s3166_s25 + $0x30] sm:$0xff]  ;;  %v434_v16 = vld [vmem:[%s3166_s25 + $0x38] sm:$0xff]  ;;  %v435_v18 = vld [vmem:[%s3166_s25 + $0x40] sm:$0xff]  ;;  %2616 = vmatpush3.bf16.msra.mxu1 %v2875_v24 }
  0x16   : > { %2657 = vmatprep.mubr.msk.bf16.mxu0 %vm829_vm0, %v459_v6  ;;  %v436_v19 = vld [vmem:[%s3166_s25 + $0x48] sm:$0xff]  ;;  %v462_v21 = vpack.c.bf16 %v434_v16, %v433_v15  ;;  %v475_v25 = vld [vmem:[%s3200_s20] sm:$0xff]  ;;  %v477_v27 = vld [vmem:[%s3200_s20 + $0x10] sm:$0xff] }
  0x17   : > { %2654 = vmatpush3.bf16.msra.mxu0 %v2864_v2  ;;  %v463_v22 = vpack.c.bf16 %v436_v19, %v435_v18  ;;  %v476_v26 = vld [vmem:[%s3200_s20 + $0x8] sm:$0xff]  ;;  %v478_v28 = vld [vmem:[%s3200_s20 + $0x18] sm:$0xff]  ;;  %v437_v29 = vld [vmem:[%s3166_s25 + $0x50] sm:$0xff] }
  0x18   : > { %2655 = vmatprep.subr.bf16.mxu0 %v2865_v5  ;;  %v507_v30 = vpack.c.bf16 %v476_v26, %v475_v25  ;;  %v438_v31 = vld [vmem:[%s3166_s25 + $0x58] sm:$0xff]  ;;  %v508_v32 = vpack.c.bf16 %v478_v28, %v477_v27  ;;  %v479_v33 = vld [vmem:[%s3200_s20 + $0x20] sm:$0xff]  ;;  %v480_v34 = vld [vmem:[%s3200_s20 + $0x28] sm:$0xff] }
  0x19   : > { %v439_v35 = vld [vmem:[%s3166_s25 + $0x60] sm:$0xff]  ;;  %v440_v36 = vld [vmem:[%s3166_s25 + $0x68] sm:$0xff]  ;;  %v509_v38 = vpack.c.bf16 %v480_v34, %v479_v33  ;;  %v464_v39 = vpack.c.bf16 %v438_v31, %v437_v29  ;;  %v481_v42 = vld [vmem:[%s3200_s20 + $0x30] sm:$0xff] }
  0x1a   : > { %2617 = vmatprep.mubr.msk.bf16.mxu1 %vm595_vm1, %v507_v30  ;;  %v465_v40 = vpack.c.bf16 %v440_v36, %v439_v35  ;;  %v482_v43 = vld [vmem:[%s3200_s20 + $0x38] sm:$0xff]  ;;  %v483_v44 = vld [vmem:[%s3200_s20 + $0x40] sm:$0xff]  ;;  %v484_v45 = vld [vmem:[%s3200_s20 + $0x48] sm:$0xff] }
  0x1b   : > { %2656 = vmatpush3.bf16.msra.mxu0 %v2865_v5  ;;  %2618 = vmatmul.mubr.msk.bf16.vlgmr.msra.gmra.mrb[0].mxu1 %vm595_vm1, %v508_v32  ;;  %v441_v46 = vld [vmem:[%s3166_s25 + $0x70] sm:$0xff]  ;;  %v442_v47 = vld [vmem:[%s3166_s25 + $0x78] sm:$0xff]  ;;  %v510_v48 = vpack.c.bf16 %v482_v43, %v481_v42  ;;  %v443_v49 = vld [vmem:[%s3166_s25 + $0x80] sm:$0xff]  ;;  %v511_v52 = vpack.c.bf16 %v484_v45, %v483_v44 }
  0x1c   : > { %2689 = vmatprep.subr.bf16.mxu0 %v2866_v7  ;;  %2621 = vmatprep.mubr.msk.bf16.mxu1 %vm595_vm1, %v509_v38  ;;  %v444_v50 = vld [vmem:[%s3166_s25 + $0x88] sm:$0xff]  ;;  %v466_v53 = vpack.c.bf16 %v442_v47, %v441_v46  ;;  %v485_v56 = vld [vmem:[%s3200_s20 + $0x50] sm:$0xff]  ;;  %v486_v57 = vld [vmem:[%s3200_s20 + $0x58] sm:$0xff] }
  0x1d   : > { %v467_v54 = vpack.c.bf16 %v444_v50, %v443_v49  ;;  %v487_v58 = vld [vmem:[%s3200_s20 + $0x60] sm:$0xff]  ;;  %v488_v59 = vld [vmem:[%s3200_s20 + $0x68] sm:$0xff]  ;;  %v445_v60 = vld [vmem:[%s3166_s25 + $0x90] sm:$0xff]  ;;  %v512_v62 = vpack.c.bf16 %v486_v57, %v485_v56 }
  0x1e   : > { %2658 = vmatmul.mubr.msk.bf16.vlgmr.msra.gmra.mrb[0].mxu0 %vm829_vm0, %v460_v12  ;;  %v446_v61 = vld [vmem:[%s3166_s25 + $0x98] sm:$0xff]  ;;  %v447_v63 = vld [vmem:[%s3166_s25 + $0xa0] sm:$0xff]  ;;  %v448_v0 = vld [vmem:[%s3166_s25 + $0xa8] sm:$0xff]  ;;  %v513_v1 = vpack.c.bf16 %v488_v59, %v487_v58 }
  0x1f   : > { %2690 = vmatpush3.bf16.msra.mxu0 %v2866_v7  ;;  %2661 = vmatprep.mubr.msk.bf16.mxu0 %vm829_vm0, %v461_v13  ;;  %v468_v2 = vpack.c.bf16 %v446_v61, %v445_v60  ;;  %v489_v3 = vld [vmem:[%s3200_s20 + $0x70] sm:$0xff]  ;;  %v490_v4 = vld [vmem:[%s3200_s20 + $0x78] sm:$0xff]  ;;  %v2876_v5 = vld [vmem:[%s3953_s8] sm:$0xff]   ;;  %v469_v6 = vpack.c.bf16 %v448_v0, %v447_v63 }
  0x20   : > { %2691 = vmatprep.subr.bf16.mxu0 %v2867_v14  ;;  %v2877_v7 = vld [vmem:[%s3953_s8 + $0x8] sm:$0xff]   ;;  %v491_v8 = vld [vmem:[%s3200_s20 + $0x80] sm:$0xff]  ;;  %2737 = vmatprep.subr.bf16.mxu1 %v2876_v5  ;;  %v449_v9 = vld [vmem:[%s3166_s25 + $0xb0] sm:$0xff] }
  0x21   : > { %v450_v10 = vld [vmem:[%s3166_s25 + $0xb8] sm:$0xff]  ;;  %v492_v11 = vld [vmem:[%s3200_s20 + $0x88] sm:$0xff]  ;;  %2738 = vmatpush3.bf16.msra.mxu1 %v2876_v5  ;;  %v2878_v12 = vld [vmem:[%s3953_s8 + $0x10] sm:$0xff]  }
  0x22   : > { %2739 = vmatprep.subr.bf16.mxu1 %v2877_v7  ;;  %v451_v13 = vld [vmem:[%s3166_s25 + $0xc0] sm:$0xff]  ;;  %v452_v15 = vld [vmem:[%s3166_s25 + $0xc8] sm:$0xff]  ;;  %v515_v16 = vpack.c.bf16 %v492_v11, %v491_v8  ;;  %v2879_v18 = vld [vmem:[%s3953_s8 + $0x18] sm:$0xff]  }
  0x23   : > { %2692 = vmatpush3.bf16.msra.mxu0 %v2867_v14  ;;  %2622 = vmatmul.mubr.msk.bf16.gmra.mrb[4].mxu1 %vm595_vm1, %v510_v48  ;;  %v514_v14 = vpack.c.bf16 %v490_v4, %v489_v3  ;;  %v471_v19 = vpack.c.bf16 %v452_v15, %v451_v13  ;;  %v493_v20 = vld [vmem:[%s3200_s20 + $0x90] sm:$0xff]  ;;  %v2880_v24 = vld [vmem:[%s3953_s8 + $0x20] sm:$0xff]   ;;  %v454_v26 = vld [vmem:[%s3166_s25 + $0xd8] sm:$0xff] }
  0x24   : > { %2693 = vmatprep.subr.bf16.mxu0 %v2868_v17  ;;  %2625 = vmatprep.mubr.msk.bf16.mxu1 %vm595_vm1, %v511_v52  ;;  %v453_v25 = vld [vmem:[%s3166_s25 + $0xd0] sm:$0xff]  ;;  %v455_v28 = vld [vmem:[%s3166_s25 + $0xe0] sm:$0xff]  ;;  %v456_v29 = vld [vmem:[%s3166_s25 + $0xe8] sm:$0xff] }
  0x25   : > { %2740 = vmatpush3.bf16.msra.mxu1 %v2877_v7  ;;  %v472_v31 = vpack.c.bf16 %v454_v26, %v453_v25  ;;  %v2881_v32 = vld [vmem:[%s3953_s8 + $0x28] sm:$0xff]   ;;  %v473_v33 = vpack.c.bf16 %v456_v29, %v455_v28  ;;  %v497_v34 = vld [vmem:[%s3200_s20 + $0xb0] sm:$0xff]  ;;  %v498_v35 = vld [vmem:[%s3200_s20 + $0xb8] sm:$0xff] }
  0x26   : > { %2662 = vmatmul.mubr.msk.bf16.gmra.mrb[4].mxu0 %vm829_vm0, %v462_v21  ;;  %2741 = vmatprep.subr.bf16.mxu1 %v2878_v12  ;;  %v494_v21 = vld [vmem:[%s3200_s20 + $0x98] sm:$0xff]  ;;  %v499_v36 = vld [vmem:[%s3200_s20 + $0xc0] sm:$0xff]  ;;  %v2882_v38 = vld [vmem:[%s3953_s8 + $0x30] sm:$0xff]  }
  0x27   : > { %2665 = vmatprep.mubr.msk.bf16.mxu0 %vm829_vm0, %v463_v22  ;;  %2694 = vmatpush3.bf16.msra.mxu0 %v2868_v17  ;;  %v470_v17 = vpack.c.bf16 %v450_v10, %v449_v9  ;;  %v495_v22 = vld [vmem:[%s3200_s20 + $0xa0] sm:$0xff]  ;;  %v516_v27 = vpack.c.bf16 %v494_v21, %v493_v20  ;;  %v524_v43 = vld [vmem:[%s3307_s16 + $0x8] sm:$0xff]  ;;  %v501_v47 = vld [vmem:[%s3200_s20 + $0xd0] sm:$0xff] }
  0x28   : > { %2695 = vmatprep.subr.bf16.mxu0 %v2869_v23  ;;  %v523_v42 = vld [vmem:[%s3307_s16] sm:$0xff]  ;;  %v502_v48 = vld [vmem:[%s3200_s20 + $0xd8] sm:$0xff]  ;;  %v504_v50 = vld [vmem:[%s3200_s20 + $0xe8] sm:$0xff] }
  0x29   : > { %2742 = vmatpush3.bf16.msra.mxu1 %v2878_v12  ;;  %v555_v46 = vpack.c.bf16 %v524_v43, %v523_v42  ;;  %v503_v49 = vld [vmem:[%s3200_s20 + $0xe0] sm:$0xff]  ;;  %v526_v52 = vld [vmem:[%s3307_s16 + $0x18] sm:$0xff]  ;;  %v505_v59 = vld [vmem:[%s3200_s20 + $0xf0] sm:$0xff] }
  0x2a   : > { %2743 = vmatprep.subr.bf16.mxu1 %v2879_v18  ;;  %v521_v56 = vpack.c.bf16 %v504_v50, %v503_v49  ;;  %v506_v60 = vld [vmem:[%s3200_s20 + $0xf8] sm:$0xff]  ;;  %v529_v61 = vld [vmem:[%s3307_s16 + $0x30] sm:$0xff]  ;;  %v531_v0 = vld [vmem:[%s3307_s16 + $0x40] sm:$0xff] }
  0x2b   : > { %2696 = vmatpush3.bf16.msra.mxu0 %v2869_v23  ;;  %2626 = vmatmul.mubr.msk.bf16.gmra.mrb[8].mxu1 %vm595_vm1, %v512_v62  ;;  %v496_v23 = vld [vmem:[%s3200_s20 + $0xa8] sm:$0xff]  ;;  %v530_v62 = vld [vmem:[%s3307_s16 + $0x38] sm:$0xff]  ;;  %v522_v63 = vpack.c.bf16 %v506_v60, %v505_v59  ;;  %v533_v4 = vld [vmem:[%s3307_s16 + $0x50] sm:$0xff] }
  0x2c   : > { %2697 = vmatprep.subr.bf16.mxu0 %v2870_v37  ;;  %2629 = vmatprep.mubr.msk.bf16.mxu1 %vm595_vm1, %v513_v1  ;;  %v517_v30 = vpack.c.bf16 %v496_v23, %v495_v22  ;;  %v532_v1 = vld [vmem:[%s3307_s16 + $0x48] sm:$0xff]  ;;  %v534_v5 = vld [vmem:[%s3307_s16 + $0x58] sm:$0xff]  ;;  %v537_v10 = vld [vmem:[%s3307_s16 + $0x70] sm:$0xff] }
  0x2d   : > { %2744 = vmatpush3.bf16.msra.mxu1 %v2879_v18  ;;  %v559_v3 = vpack.c.bf16 %v532_v1, %v531_v0  ;;  %v536_v7 = vld [vmem:[%s3307_s16 + $0x68] sm:$0xff]  ;;  %v560_v8 = vpack.c.bf16 %v534_v5, %v533_v4  ;;  %v538_v11 = vld [vmem:[%s3307_s16 + $0x78] sm:$0xff]  ;;  %v539_v12 = vld [vmem:[%s3307_s16 + $0x80] sm:$0xff] }
  0x2e   : > { %2666 = vmatmul.mubr.msk.bf16.gmra.mrb[8].mxu0 %vm829_vm0, %v464_v39  ;;  %2745 = vmatprep.subr.bf16.mxu1 %v2880_v24  ;;  %v457_v39 = vld [vmem:[%s3166_s25 + $0xf0] sm:$0xff]  ;;  %v540_v13 = vld [vmem:[%s3307_s16 + $0x88] sm:$0xff]  ;;  %v543_v18 = vld [vmem:[%s3307_s16 + $0xa0] sm:$0xff] }
  0x2f   : > { %2669 = vmatprep.mubr.msk.bf16.mxu0 %vm829_vm0, %v465_v40  ;;  %2698 = vmatpush3.bf16.msra.mxu0 %v2870_v37  ;;  %v500_v37 = vld [vmem:[%s3200_s20 + $0xc8] sm:$0xff]  ;;  %v458_v40 = vld [vmem:[%s3166_s25 + $0xf8] sm:$0xff]  ;;  %v563_v15 = vpack.c.bf16 %v540_v13, %v539_v12  ;;  %v545_v22 = vld [vmem:[%s3307_s16 + $0xb0] sm:$0xff] }
  0x30   : > { %2699 = vmatprep.subr.bf16.mxu0 %v2871_v41  ;;  %v519_v44 = vpack.c.bf16 %v500_v37, %v499_v36  ;;  %v474_v45 = vpack.c.bf16 %v458_v40, %v457_v39  ;;  %v546_v23 = vld [vmem:[%s3307_s16 + $0xb8] sm:$0xff]  ;;  %v548_v25 = vld [vmem:[%s3307_s16 + $0xc8] sm:$0xff]  ;;  %v549_v28 = vld [vmem:[%s3307_s16 + $0xd0] sm:$0xff] }
  0x31   : > { %2746 = vmatpush3.bf16.msra.mxu1 %v2880_v24  ;;  %v547_v24 = vld [vmem:[%s3307_s16 + $0xc0] sm:$0xff]  ;;  %v566_v26 = vpack.c.bf16 %v546_v23, %v545_v22  ;;  %v550_v29 = vld [vmem:[%s3307_s16 + $0xd8] sm:$0xff]  ;;  %v1875_v39 = vld [vmem:[%s3369_s23 + $0x8] sm:$0xff] }
  0x32   : > { %2747 = vmatprep.subr.bf16.mxu1 %v2881_v32  ;;  %v2883_v37 = vld [vmem:[%s3953_s8 + $0x38] sm:$0xff]   ;;  %v1876_v40 = vld [vmem:[%s3369_s23 + $0x10] sm:$0xff]  ;;  %v1878_v43 = vld [vmem:[%s3369_s23 + $0x20] sm:$0xff] }
  0x33   : > { %2700 = vmatpush3.bf16.msra.mxu0 %v2871_v41  ;;  %2630 = vmatmul.mubr.msk.bf16.gmra.mrb[12].mxu1 %vm595_vm1, %v514_v14  ;;  %v518_v41 = vpack.c.bf16 %v498_v35, %v497_v34  ;;  %v562_v14 = vpack.c.bf16 %v538_v11, %v537_v10  ;;  %v553_v34 = vld [vmem:[%s3307_s16 + $0xf0] sm:$0xff]  ;;  %v554_v35 = vld [vmem:[%s3307_s16 + $0xf8] sm:$0xff]  ;;  %v1886_v59 = vld [vmem:[%s3369_s23 + $0x60] sm:$0xff] }
  0x34   : > { %2701 = vmatprep.subr.bf16.mxu0 %v2872_v51  ;;  %2633 = vmatprep.mubr.msk.bf16.mxu1 %vm595_vm1, %v515_v16  ;;  %v541_v16 = vld [vmem:[%s3307_s16 + $0x90] sm:$0xff]  ;;  %v570_v36 = vpack.c.bf16 %v554_v35, %v553_v34  ;;  %v1877_v42 = vld [vmem:[%s3369_s23 + $0x18] sm:$0xff]  ;;  %v1887_v60 = vld [vmem:[%s3369_s23 + $0x68] sm:$0xff] }
  0x35   : > { %2748 = vmatpush3.bf16.msra.mxu1 %v2881_v32  ;;  %v568_v32 = vpack.c.bf16 %v550_v29, %v549_v28  ;;  %v1881_v50 = vld [vmem:[%s3369_s23 + $0x38] sm:$0xff]  ;;  %v1892_v4 = vld [vmem:[%s3369_s23 + $0x90] sm:$0xff]  ;;  %v1899_v12 = vld [vmem:[%s3369_s23 + $0xc8] sm:$0xff] }
  0x36   : > { %2670 = vmatmul.mubr.msk.bf16.gmra.mrb[12].mxu0 %vm829_vm0, %v466_v53  ;;  %2749 = vmatprep.subr.bf16.mxu1 %v2882_v38  ;;  %v520_v53 = vpack.c.bf16 %v502_v48, %v501_v47  ;;  %v1897_v10 = vld [vmem:[%s3369_s23 + $0xb8] sm:$0xff]  ;;  %v1896_v22 = vld [vmem:[%s3369_s23 + $0xb0] sm:$0xff] }
  0x37   : > { %2673 = vmatprep.mubr.msk.bf16.mxu0 %vm829_vm0, %v467_v54  ;;  %2702 = vmatpush3.bf16.msra.mxu0 %v2872_v51  ;;  %v525_v51 = vld [vmem:[%s3307_s16 + $0x10] sm:$0xff]  ;;  %v527_v54 = vld [vmem:[%s3307_s16 + $0x20] sm:$0xff]  ;;  %v1893_v11 = vld [vmem:[%s3369_s23 + $0x98] sm:$0xff] }
  0x38   : > { %2703 = vmatprep.subr.bf16.mxu0 %v2874_v55  ;;  %v556_v57 = vpack.c.bf16 %v526_v52, %v525_v51  ;;  %v1882_v51 = vld [vmem:[%s3369_s23 + $0x40] sm:$0xff]  ;;  %v1883_v52 = vld [vmem:[%s3369_s23 + $0x48] sm:$0xff]  ;;  %v1900_v29 = vld [vmem:[%s3369_s23 + $0xd0] sm:$0xff] }
  0x39   : > { %2750 = vmatpush3.bf16.msra.mxu1 %v2882_v38  ;;  %v3084_v38 = vmov 0  }
  0x3a   : > { %2751 = vmatprep.subr.bf16.mxu1 %v2883_v37  ;;  %2861 = vset.pattern.permute.xlu0 %v3084_v38 }
  0x3b   : > { %2704 = vmatpush3.bf16.msra.mxu0 %v2874_v55  ;;  %2634 = vmatmul.mubr.msk.bf16.gmra.mrb[16].mxu1 %vm595_vm1, %v516_v27  ;;  %v528_v55 = vld [vmem:[%s3307_s16 + $0x28] sm:$0xff]  ;;  %v567_v27 = vpack.c.bf16 %v548_v25, %v547_v24 }
  0x3c   : > { %2637 = vmatprep.mubr.msk.bf16.mxu1 %vm595_vm1, %v517_v30  ;;  %v557_v58 = vpack.c.bf16 %v528_v55, %v527_v54  ;;  %v551_v30 = vld [vmem:[%s3307_s16 + $0xe0] sm:$0xff]  ;;  %2860 = vset.pattern.permute.xlu1 %v3084_v38  ;;  %v1884_v54 = vld [vmem:[%s3369_s23 + $0x50] sm:$0xff] }
  0x3d   : > { %2752 = vmatpush3.bf16.msra.mxu1 %v2883_v37  ;;  %1910 = vperm.xlu0 %2861, %v1875_v39   ;;  %v1902_v37 = vld [vmem:[%s3369_s23 + $0xe0] sm:$0xff] }
  0x3e   : > { %2674 = vmatmul.mubr.msk.bf16.gmra.mrb[16].mxu0 %vm829_vm0, %v468_v2  ;;  %v558_v2 = vpack.c.bf16 %v530_v62, %v529_v61  ;;  %v1888_v62 = vld [vmem:[%s3369_s23 + $0x70] sm:$0xff] }
  0x3f   : > { %2677 = vmatprep.mubr.msk.bf16.mxu0 %vm829_vm0, %v469_v6  ;;  %v535_v6 = vld [vmem:[%s3307_s16 + $0x60] sm:$0xff] }
  0x40   : > { %v561_v9 = vpack.c.bf16 %v536_v7, %v535_v6  ;;  %v1891_v6 = vld [vmem:[%s3369_s23 + $0x88] sm:$0xff] }
  0x41   : > { %1913 = vperm.xlu0 %2861, %v1876_v40  }
  0x43   : > { %2638 = vmatmul.mubr.msk.bf16.gmra.mrb[20].mxu1 %vm595_vm1, %v518_v41  ;;  %v1874_v41 = vld [vmem:[%s3369_s23] sm:$0xff] }
  0x44   : > { %2641 = vmatprep.mubr.msk.bf16.mxu1 %vm595_vm1, %v519_v44  ;;  %1907 = vperm.xlu1 %2860, %v1874_v41   ;;  %v1879_v44 = vld [vmem:[%s3369_s23 + $0x28] sm:$0xff] }
  0x45   : > { %1919 = vperm.xlu0 %2861, %v1878_v43  }
  0x46   : > { %2678 = vmatmul.mubr.msk.bf16.gmra.mrb[20].mxu0 %vm829_vm0, %v470_v17  ;;  %v542_v17 = vld [vmem:[%s3307_s16 + $0x98] sm:$0xff] }
  0x47   : > { %2681 = vmatprep.mubr.msk.bf16.mxu0 %vm829_vm0, %v471_v19  ;;  %v544_v19 = vld [vmem:[%s3307_s16 + $0xa8] sm:$0xff]  ;;  %v564_v20 = vpack.c.bf16 %v542_v17, %v541_v16 }
  0x48   : > { %v565_v21 = vpack.c.bf16 %v544_v19, %v543_v18  ;;  %1916 = vperm.xlu1 %2860, %v1877_v42   ;;  %v1901_v18 = vld [vmem:[%s3369_s23 + $0xd8] sm:$0xff]  ;;  %v1895_v19 = vld [vmem:[%s3369_s23 + $0xa8] sm:$0xff] }
  0x4b   : > { %2642 = vmatmul.mubr.msk.bf16.gmra.mrb[24].mxu1 %vm595_vm1, %v520_v53 }
  0x4c   : > { %2645 = vmatprep.mubr.msk.bf16.mxu1 %vm595_vm1, %v521_v56  ;;  %1922 = vperm.xlu1 %2860, %v1879_v44  }
  0x4e   : > { %2682 = vmatmul.mubr.msk.bf16.gmra.mrb[24].mxu0 %vm829_vm0, %v472_v31  ;;  %v552_v31 = vld [vmem:[%s3307_s16 + $0xe8] sm:$0xff] }
  0x4f   : > { %2685 = vmatprep.mubr.msk.bf16.mxu0 %vm829_vm0, %v473_v33  ;;  %v569_v33 = vpack.c.bf16 %v552_v31, %v551_v30 }
  0x50   : > { %1928 = vperm.xlu1 %2860, %v1881_v50  }
  0x53   : > { %2646 = vmatmul.mubr.msk.bf16.gmra.mrb[28].mxu1 %vm595_vm1, %v522_v63 }
  0x54   : > { %1934 = vperm.xlu1 %2860, %v1883_v52  }
  0x56   : > { %2686 = vmatmul.mubr.msk.bf16.gmra.mrb[28].mxu0 %vm829_vm0, %v474_v45 }
  0x57   : > { %2705 = vmatprep.mubr.bf16.mxu0 %v555_v46  ;;  %v1880_v46 = vld [vmem:[%s3369_s23 + $0x30] sm:$0xff] }
  0x58   : > { %1925 = vperm.xlu0 %2861, %v1880_v46  }
  0x5c   : > { %1931 = vperm.xlu0 %2861, %v1882_v51  }
  0x5e   : > { %2706 = vmatmul.mubr.bf16.vlgmr.msra.gmra.mrb[0].mxu0 %v556_v57 }
  0x5f   : > { %2709 = vmatprep.mubr.bf16.mxu0 %v557_v58  ;;  %v1885_v58 = vld [vmem:[%s3369_s23 + $0x58] sm:$0xff] }
  0x60   : > { %1937 = vperm.xlu0 %2861, %v1884_v54   ;;  %1940 = vperm.xlu1 %2860, %v1885_v58  }
  0x64   : > { %1943 = vperm.xlu0 %2861, %v1886_v59   ;;  %1946 = vperm.xlu1 %2860, %v1887_v60  }
  0x66   : > { %2710 = vmatmul.mubr.bf16.gmra.mrb[4].mxu0 %v558_v2  ;;  %v1889_v2 = vld [vmem:[%s3369_s23 + $0x78] sm:$0xff] }
  0x67   : > { %2713 = vmatprep.mubr.bf16.mxu0 %v559_v3  ;;  %v1890_v3 = vld [vmem:[%s3369_s23 + $0x80] sm:$0xff] }
  0x68   : > { %1949 = vperm.xlu0 %2861, %v1888_v62   ;;  %1952 = vperm.xlu1 %2860, %v1889_v2  }
  0x6c   : > { %1955 = vperm.xlu0 %2861, %v1890_v3   ;;  %1961 = vperm.xlu1 %2860, %v1892_v4  }
  0x6e   : > { %2714 = vmatmul.mubr.bf16.gmra.mrb[8].mxu0 %v560_v8 }
  0x6f   : > { %2717 = vmatprep.mubr.bf16.mxu0 %v561_v9 }
  0x70   : > { %1958 = vperm.xlu0 %2861, %v1891_v6   ;;  %1976 = vperm.xlu1 %2860, %v1897_v10  }
  0x74   : > { %1964 = vperm.xlu0 %2861, %v1893_v11   ;;  %1982 = vperm.xlu1 %2860, %v1899_v12  }
  0x76   : > { %2718 = vmatmul.mubr.bf16.gmra.mrb[12].mxu0 %v562_v14  ;;  %v1894_v14 = vld [vmem:[%s3369_s23 + $0xa0] sm:$0xff] }
  0x77   : > { %2721 = vmatprep.mubr.bf16.mxu0 %v563_v15 }
  0x78   : > { %1967 = vperm.xlu0 %2861, %v1894_v14   ;;  %1988 = vperm.xlu1 %2860, %v1901_v18  }
  0x7c   : > { %1970 = vperm.xlu0 %2861, %v1895_v19  }
  0x7e   : > { %2722 = vmatmul.mubr.bf16.gmra.mrb[16].mxu0 %v564_v20  ;;  %v1904_v20 = vld [vmem:[%s3369_s23 + $0xf0] sm:$0xff] }
  0x7f   : > { %2725 = vmatprep.mubr.bf16.mxu0 %v565_v21  ;;  %1997 = vperm.xlu1 %2860, %v1904_v20  }
  0x80   : > { %1973 = vperm.xlu0 %2861, %v1896_v22  }
  0x86   : > { %2726 = vmatmul.mubr.bf16.gmra.mrb[20].mxu0 %v566_v26  ;;  %v1905_v26 = vld [vmem:[%s3369_s23 + $0xf8] sm:$0xff] }
  0x87   : > { %2729 = vmatprep.mubr.bf16.mxu0 %v567_v27  ;;  %v1898_v27 = vld [vmem:[%s3369_s23 + $0xc0] sm:$0xff]  ;;  %2000 = vperm.xlu1 %2860, %v1905_v26  }
  0x88   : > { %1979 = vperm.xlu0 %2861, %v1898_v27  }
  0x8c   : > { %1985 = vperm.xlu0 %2861, %v1900_v29  }
  0x8e   : > { %2730 = vmatmul.mubr.bf16.gmra.mrb[24].mxu0 %v568_v32 }
  0x8f   : > { %2733 = vmatprep.mubr.bf16.mxu0 %v569_v33  ;;  %v3458_v33 = vld [vmem:[%s3952_s7] ss:$0 sm:$0xff] }
  0x90   : > { %1991 = vperm.xlu0 %2861, %v1902_v37  }
  0x96   : > { %2734 = vmatmul.mubr.bf16.gmra.mrb[28].mxu0 %v570_v36 }
  0xee   : > { %v3377_v45 = vpop.f32.mrb[0].mxu1 }
  0xef   : > { %v3380_v47 = vpop.f32.mrb[1].mxu1 }
  0xf0   : > { %v3382_v48 = vpop.f32.mrb[2].mxu1 }
  0xf1   : > { %v3384_v49 = vpop.f32.mrb[3].mxu1 }
  0xf6   : > { %v3389_v53 = vpop.f32.mrb[4].mxu1 }
  0xf7   : > { %v3392_v55 = vpop.f32.mrb[5].mxu1 }
  0xf8   : > { %v3394_v56 = vpop.f32.mrb[6].mxu1 }
  0xf9   : > { %v3396_v57 = vpop.f32.mrb[7].mxu1 }
  0xfe   : > { %v3401_v61 = vpop.f32.mrb[8].mxu1 }
  0xff   : > { %v3404_v63 = vpop.f32.mrb[9].mxu1 }
 0x100   : > { %v3406_v0 = vpop.f32.mrb[10].mxu1 }
 0x101   : > { %v3408_v1 = vpop.f32.mrb[11].mxu1 }
 0x106   : > { %v3413_v5 = vpop.f32.mrb[12].mxu1 }
 0x107   : > { %v3416_v7 = vpop.f32.mrb[13].mxu1 }
 0x108   : > { %v3418_v8 = vpop.f32.mrb[14].mxu1 }
 0x109   : > { %v3420_v9 = vpop.f32.mrb[15].mxu1 }
 0x10e   : > { %v3425_v13 = vpop.f32.mrb[16].mxu1 }
 0x10f   : > { %v3428_v15 = vpop.f32.mrb[17].mxu1 }
 0x110   : > { %v3430_v16 = vpop.f32.mrb[18].mxu1 }
 0x111   : > { %v3432_v17 = vpop.f32.mrb[19].mxu1 }
 0x116   : > { %v3437_v21 = vpop.f32.mrb[20].mxu1 }
 0x117   : > { %v3440_v23 = vpop.f32.mrb[21].mxu1 }
 0x118   : > { %v3442_v24 = vpop.f32.mrb[22].mxu1 }
 0x119   : > { %v3444_v25 = vpop.f32.mrb[23].mxu1 }
 0x11e   : > { %v3448_v28 = vpop.f32.mrb[24].mxu1 }
 0x11f   : > { %v3451_v30 = vpop.f32.mrb[25].mxu1 }
 0x120   : > { %v3453_v31 = vpop.f32.mrb[26].mxu1 }
 0x121   : > { %v3460_v34 = vpop.f32.mrb[27].mxu1 }
 0x126   : > { %v3470_v50 = vpop.f32.mrb[28].mxu1 }
 0x127   : > { %v3474_v52 = vpop.f32.mrb[29].mxu1 }
 0x128   : > { %v3476_v58 = vpop.f32.mrb[30].mxu1 }
 0x129   : > { %v3478_v62 = vpop.f32.mrb[31].mxu1 }
 0x131   : > { %v2707_v32 = vpop.f32.mrb[0].mxu0 }
 0x132   : > { %v2785_v35 = vadd.f32 %v2707_v32, %v3377_v45  ;;  %v1137_v36 = vpop.f32.mrb[1].mxu0  ;;  %v1903_v45 = vld [vmem:[%s3369_s23 + $0xe8] sm:$0xff] }
 0x133   : > { %v2786_v38 = vadd.f32 %v1137_v36, %v3380_v47  ;;  %v2708_v39 = vpop.f32.mrb[2].mxu0  ;;  %1994 = vperm.xlu0 %2861, %v1903_v45  }
 0x134   : > { %v1305_v40 = vadd.f32 %v2785_v35, %v3458_v33  ;;  %v2787_v41 = vadd.f32 %v2708_v39, %v3382_v48  ;;  %v1140_v42 = vpop.f32.mrb[3].mxu0 }
 0x135   : > { %v1303_v43 = vadd.f32 %v2786_v38, %v3458_v33  ;;  %v2788_v44 = vadd.f32 %v1140_v42, %v3384_v49 }
 0x136   : > { %v1306_v46 = vadd.f32 %v2787_v41, %v3458_v33  ;;  %v1337_v47 = vmax.f32 %v1305_v40, 0.0 }
 0x137   : > { %v1304_v51 = vadd.f32 %v2788_v44, %v3458_v33  ;;  %v1335_v48 = vmax.f32 %v1303_v43, 0.0 }
 0x138   : > { %v1338_v54 = vmax.f32 %v1306_v46, 0.0 }
 0x139   : > { %v1336_v59 = vmax.f32 %v1304_v51, 0.0  ;;  %v2711_v60 = vpop.f32.mrb[4].mxu0 }
 0x13a   : > { %v1368_v49 = vpack.c.bf16 %v1338_v54, %v1337_v47  ;;  %v2789_v2 = vadd.f32 %v2711_v60, %v3389_v53  ;;  %v1153_v3 = vpop.f32.mrb[5].mxu0 }
 0x13b   : > { %v2790_v4 = vadd.f32 %v1153_v3, %v3392_v55  ;;  %v2712_v6 = vpop.f32.mrb[6].mxu0  ;;  %v1367_v10 = vpack.c.bf16 %v1336_v59, %v1335_v48 }
 0x13c   : > { %v1309_v11 = vadd.f32 %v2789_v2, %v3458_v33  ;;  %v2791_v12 = vadd.f32 %v2712_v6, %v3394_v56  ;;  %v1156_v14 = vpop.f32.mrb[7].mxu0 }
 0x13d   : > { %v1307_v18 = vadd.f32 %v2790_v4, %v3458_v33  ;;  %v2792_v19 = vadd.f32 %v1156_v14, %v3396_v57  ;;  %2753 = vmatprep.mubr.bf16.mxu1 %v1367_v10 }
 0x13e   : > { %v1310_v20 = vadd.f32 %v2791_v12, %v3458_v33  ;;  %2754 = vmatmul.mubr.bf16.vlgmr.msra.gmra.mrb[32].mxu1 %v1368_v49  ;;  %v1341_v22 = vmax.f32 %v1309_v11, 0.0 }
 0x13f   : > { %v1308_v53 = vadd.f32 %v2792_v19, %v3458_v33  ;;  %v1339_v55 = vmax.f32 %v1307_v18, 0.0 }
 0x140   : > { %v1342_v26 = vmax.f32 %v1310_v20, 0.0 }
 0x141   : > { %v1340_v27 = vmax.f32 %v1308_v53, 0.0  ;;  %v2715_v29 = vpop.f32.mrb[8].mxu0 }
 0x142   : > { %v2793_v32 = vadd.f32 %v2715_v29, %v3401_v61  ;;  %v1169_v35 = vpop.f32.mrb[9].mxu0  ;;  %v1370_v56 = vpack.c.bf16 %v1342_v26, %v1341_v22 }
 0x143   : > { %v2794_v36 = vadd.f32 %v1169_v35, %v3404_v63  ;;  %v2716_v37 = vpop.f32.mrb[10].mxu0  ;;  %v1369_v38 = vpack.c.bf16 %v1340_v27, %v1339_v55 }
 0x144   : > { %v1313_v57 = vadd.f32 %v2793_v32, %v3458_v33  ;;  %v2795_v39 = vadd.f32 %v2716_v37, %v3406_v0  ;;  %v1172_v40 = vpop.f32.mrb[11].mxu0 }
 0x145   : > { %v1311_v41 = vadd.f32 %v2794_v36, %v3458_v33  ;;  %v2796_v42 = vadd.f32 %v1172_v40, %v3408_v1  ;;  %2757 = vmatprep.mubr.bf16.mxu1 %v1369_v38 }
 0x146   : > { %v1314_v43 = vadd.f32 %v2795_v39, %v3458_v33  ;;  %2758 = vmatmul.mubr.bf16.gmra.mrb[36].mxu1 %v1370_v56  ;;  %v1345_v44 = vmax.f32 %v1313_v57, 0.0 }
 0x147   : > { %v1312_v61 = vadd.f32 %v2796_v42, %v3458_v33  ;;  %v1343_v63 = vmax.f32 %v1311_v41, 0.0 }
 0x148   : > { %v1346_v46 = vmax.f32 %v1314_v43, 0.0 }
 0x149   : > { %v1344_v45 = vmax.f32 %v1312_v61, 0.0  ;;  %v2719_v51 = vpop.f32.mrb[12].mxu0 }
 0x14a   : > { %v2797_v47 = vadd.f32 %v2719_v51, %v3413_v5  ;;  %v1185_v54 = vpop.f32.mrb[13].mxu0  ;;  %v1372_v0 = vpack.c.bf16 %v1346_v46, %v1345_v44 }
 0x14b   : > { %v2798_v48 = vadd.f32 %v1185_v54, %v3416_v7  ;;  %v2720_v59 = vpop.f32.mrb[14].mxu0  ;;  %v1371_v60 = vpack.c.bf16 %v1344_v45, %v1343_v63 }
 0x14c   : > { %v1317_v1 = vadd.f32 %v2797_v47, %v3458_v33  ;;  %v2799_v49 = vadd.f32 %v2720_v59, %v3418_v8  ;;  %v1188_v2 = vpop.f32.mrb[15].mxu0 }
 0x14d   : > { %v1315_v3 = vadd.f32 %v2798_v48, %v3458_v33  ;;  %v2800_v4 = vadd.f32 %v1188_v2, %v3420_v9  ;;  %2761 = vmatprep.mubr.bf16.mxu1 %v1371_v60 }
 0x14e   : > { %v1318_v6 = vadd.f32 %v2799_v49, %v3458_v33  ;;  %2762 = vmatmul.mubr.bf16.gmra.mrb[40].mxu1 %v1372_v0  ;;  %v1349_v10 = vmax.f32 %v1317_v1, 0.0 }
 0x14f   : > { %v1316_v5 = vadd.f32 %v2800_v4, %v3458_v33  ;;  %v1347_v7 = vmax.f32 %v1315_v3, 0.0 }
 0x150   : > { %v1350_v11 = vmax.f32 %v1318_v6, 0.0 }
 0x151   : > { %v1348_v12 = vmax.f32 %v1316_v5, 0.0  ;;  %v2723_v14 = vpop.f32.mrb[16].mxu0 }
 0x152   : > { %v2801_v18 = vadd.f32 %v2723_v14, %v3425_v13  ;;  %v1201_v19 = vpop.f32.mrb[17].mxu0  ;;  %v1374_v8 = vpack.c.bf16 %v1350_v11, %v1349_v10 }
 0x153   : > { %v2802_v20 = vadd.f32 %v1201_v19, %v3428_v15  ;;  %v2724_v53 = vpop.f32.mrb[18].mxu0  ;;  %v1373_v22 = vpack.c.bf16 %v1348_v12, %v1347_v7 }
 0x154   : > { %v1321_v9 = vadd.f32 %v2801_v18, %v3458_v33  ;;  %v2803_v26 = vadd.f32 %v2724_v53, %v3430_v16  ;;  %v1204_v55 = vpop.f32.mrb[19].mxu0 }
 0x155   : > { %v1319_v27 = vadd.f32 %v2802_v20, %v3458_v33  ;;  %v2804_v29 = vadd.f32 %v1204_v55, %v3432_v17  ;;  %2765 = vmatprep.mubr.bf16.mxu1 %v1373_v22 }
 0x156   : > { %v1322_v32 = vadd.f32 %v2803_v26, %v3458_v33  ;;  %2766 = vmatmul.mubr.bf16.gmra.mrb[44].mxu1 %v1374_v8  ;;  %v1353_v35 = vmax.f32 %v1321_v9, 0.0 }
 0x157   : > { %v1320_v13 = vadd.f32 %v2804_v29, %v3458_v33  ;;  %v1351_v15 = vmax.f32 %v1319_v27, 0.0 }
 0x158   : > { %v1354_v56 = vmax.f32 %v1322_v32, 0.0 }
 0x159   : > { %v1352_v36 = vmax.f32 %v1320_v13, 0.0  ;;  %v2727_v37 = vpop.f32.mrb[20].mxu0 }
 0x15a   : > { %v2805_v38 = vadd.f32 %v2727_v37, %v3437_v21  ;;  %v1217_v57 = vpop.f32.mrb[21].mxu0  ;;  %v1376_v16 = vpack.c.bf16 %v1354_v56, %v1353_v35 }
 0x15b   : > { %v2806_v39 = vadd.f32 %v1217_v57, %v3440_v23  ;;  %v2728_v40 = vpop.f32.mrb[22].mxu0  ;;  %v1375_v41 = vpack.c.bf16 %v1352_v36, %v1351_v15 }
 0x15c   : > { %v1325_v17 = vadd.f32 %v2805_v38, %v3458_v33  ;;  %v2807_v42 = vadd.f32 %v2728_v40, %v3442_v24  ;;  %v1220_v43 = vpop.f32.mrb[23].mxu0 }
 0x15d   : > { %v1323_v61 = vadd.f32 %v2806_v39, %v3458_v33  ;;  %v2808_v44 = vadd.f32 %v1220_v43, %v3444_v25  ;;  %2769 = vmatprep.mubr.bf16.mxu1 %v1375_v41 }
 0x15e   : > { %v1326_v46 = vadd.f32 %v2807_v42, %v3458_v33  ;;  %2770 = vmatmul.mubr.bf16.gmra.mrb[48].mxu1 %v1376_v16  ;;  %v1357_v63 = vmax.f32 %v1325_v17, 0.0 }
 0x15f   : > { %v1324_v21 = vadd.f32 %v2808_v44, %v3458_v33  ;;  %v1355_v23 = vmax.f32 %v1323_v61, 0.0 }
 0x160   : > { %v1358_v45 = vmax.f32 %v1326_v46, 0.0 }
 0x161   : > { %v1356_v51 = vmax.f32 %v1324_v21, 0.0  ;;  %v2731_v47 = vpop.f32.mrb[24].mxu0 }
 0x162   : > { %v2809_v54 = vadd.f32 %v2731_v47, %v3448_v28  ;;  %v1233_v0 = vpop.f32.mrb[25].mxu0  ;;  %v1378_v24 = vpack.c.bf16 %v1358_v45, %v1357_v63 }
 0x163   : > { %v2810_v48 = vadd.f32 %v1233_v0, %v3451_v30  ;;  %v2732_v59 = vpop.f32.mrb[26].mxu0  ;;  %v1377_v60 = vpack.c.bf16 %v1356_v51, %v1355_v23 }
 0x164   : > { %v1329_v25 = vadd.f32 %v2809_v54, %v3458_v33  ;;  %v2811_v1 = vadd.f32 %v2732_v59, %v3453_v31  ;;  %v1236_v49 = vpop.f32.mrb[27].mxu0 }
 0x165   : > { %v1327_v2 = vadd.f32 %v2810_v48, %v3458_v33  ;;  %v2812_v3 = vadd.f32 %v1236_v49, %v3460_v34  ;;  %2773 = vmatprep.mubr.bf16.mxu1 %v1377_v60 }
 0x166   : > { %v1330_v4 = vadd.f32 %v2811_v1, %v3458_v33  ;;  %2774 = vmatmul.mubr.bf16.gmra.mrb[52].mxu1 %v1378_v24  ;;  %v1361_v6 = vmax.f32 %v1329_v25, 0.0 }
 0x167   : > { %v1328_v28 = vadd.f32 %v2812_v3, %v3458_v33  ;;  %v1359_v30 = vmax.f32 %v1327_v2, 0.0 }
 0x168   : > { %v1362_v5 = vmax.f32 %v1330_v4, 0.0 }
 0x169   : > { %v1360_v10 = vmax.f32 %v1328_v28, 0.0  ;;  %v2735_v11 = vpop.f32.mrb[28].mxu0 }
 0x16a   : > { %v2813_v7 = vadd.f32 %v2735_v11, %v3470_v50  ;;  %v1249_v12 = vpop.f32.mrb[29].mxu0  ;;  %v1380_v31 = vpack.c.bf16 %v1362_v5, %v1361_v6 }
 0x16b   : > { %v2814_v14 = vadd.f32 %v1249_v12, %v3474_v52  ;;  %v2736_v18 = vpop.f32.mrb[30].mxu0  ;;  %v1379_v19 = vpack.c.bf16 %v1360_v10, %v1359_v30 }
 0x16c   : > { %v1333_v34 = vadd.f32 %v2813_v7, %v3458_v33  ;;  %v2815_v8 = vadd.f32 %v2736_v18, %v3476_v58  ;;  %v1252_v20 = vpop.f32.mrb[31].mxu0  ;;  %v1615_v58 = vlaneseq }
 0x16d   : > { %v1331_v53 = vadd.f32 %v2814_v14, %v3458_v33  ;;  %v2816_v22 = vadd.f32 %v1252_v20, %v3478_v62  ;;  %2777 = vmatprep.mubr.bf16.mxu1 %v1379_v19  ;;  %v3541_v62 = vld [vmem:[%s3954_s9] ss:$0 sm:$0xff] }
 0x16e   : > { %v1334_v9 = vadd.f32 %v2815_v8, %v3458_v33  ;;  %2778 = vmatmul.mubr.bf16.gmra.mrb[56].mxu1 %v1380_v31  ;;  %v1365_v26 = vmax.f32 %v1333_v34, 0.0  ;;  %v3536_v13 = vand.u32 127, %v1615_v58 }
 0x16f   : > { %v1332_v50 = vadd.f32 %v2816_v22, %v3458_v33  ;;  %v1363_v52 = vmax.f32 %v1331_v53, 0.0 }
 0x170   : > { %v1366_v55 = vmax.f32 %v1334_v9, 0.0  ;;  %vm1617_vm2 = vcmp.lt.s32.totalorder %v3536_v13, 16 }
 0x171   : > { %v1364_v27 = vmax.f32 %v1332_v50, 0.0 }
 0x172   : > { %v1382_v29 = vpack.c.bf16 %v1366_v55, %v1365_v26 }
 0x173   : > { %v1381_v32 = vpack.c.bf16 %v1364_v27, %v1363_v52  ;;  %v3654_v27 = vpop.permute.xlu0 %1910 }
 0x174   : > { %vm2003_vm6 = vcmp.eq.s32.totalorder %v3536_v13, %v3654_v27 }
 0x175   : > { %2781 = vmatprep.mubr.bf16.mxu1 %v1381_v32 }
 0x176   : > { %2782 = vmatmul.mubr.bf16.gmra.mrb[60].mxu1 %v1382_v29 }
 0x211   : > { %v2755_v35 = vpop.f32.mrb[32].mxu1 }
 0x212   : > { %v1497_v33 = vadd.f32 %v2755_v35, %v3541_v62  ;;  %v1488_v56 = vpop.f32.mrb[33].mxu1 }
 0x213   : > { %v1489_v15 = vadd.f32 %v3541_v62, %v1488_v56  ;;  %v2756_v36 = vpop.f32.mrb[34].mxu1 }
 0x214   : > { %v1500_v37 = vadd.f32 %v2756_v36, %v3541_v62  ;;  %v1491_v38 = vpop.f32.mrb[35].mxu1  ;;  %v3549_v57 = vsel %vm1617_vm2, %v1497_v33, -1e+30 }
 0x215   : > { %v1492_v16 = vadd.f32 %v3541_v62, %v1491_v38  ;;  %1654 = vmax.xlane.f32.xlu1 %v3549_v57  ;;  %v3555_v39 = vsel %vm1617_vm2, %v1489_v15, -1e+30 }
 0x216   : > { %1650 = vmax.xlane.f32.xlu0 %v3555_v39  ;;  %v3560_v40 = vsel %vm1617_vm2, %v1500_v37, -1e+30 }
 0x217   : > { %v3565_v17 = vsel %vm1617_vm2, %v1492_v16, -1e+30 }
 0x219   : > { %1656 = vmax.xlane.f32.xlu1 %v3560_v40  ;;  %v2759_v41 = vpop.f32.mrb[36].mxu1 }
 0x21a   : > { %v1513_v42 = vadd.f32 %v2759_v41, %v3541_v62  ;;  %1652 = vmax.xlane.f32.xlu0 %v3565_v17  ;;  %v1504_v43 = vpop.f32.mrb[37].mxu1 }
 0x21b   : > { %v2760_v61 = vpop.f32.mrb[38].mxu1  ;;  %v1505_v63 = vadd.f32 %v3541_v62, %v1504_v43 }
 0x21c   : > { %v1516_v44 = vadd.f32 %v2760_v61, %v3541_v62  ;;  %v1507_v46 = vpop.f32.mrb[39].mxu1  ;;  %v3572_v21 = vsel %vm1617_vm2, %v1513_v42, -1e+30  ;;  %v3679_v42 = vpop.permute.xlu0 %1913 }
 0x21d   : > { %v1508_v45 = vadd.f32 %v3541_v62, %v1507_v46  ;;  %v3584_v47 = vsel %vm1617_vm2, %v1505_v63, -1e+30  ;;  %vm2004_vm3 = vcmp.eq.s32.totalorder %v3536_v13, %v3679_v42 }
 0x21e   : > { %1662 = vmax.xlane.f32.xlu0 %v3572_v21  ;;  %v3579_v23 = vsel %vm1617_vm2, %v1516_v44, -1e+30 }
 0x21f   : > { %1664 = vmax.xlane.f32.xlu1 %v3579_v23  ;;  %v3590_v24 = vsel %vm1617_vm2, %v1508_v45, -1e+30 }
 0x221   : > { %v2763_v51 = vpop.f32.mrb[40].mxu1 }
 0x222   : > { %v1529_v54 = vadd.f32 %v2763_v51, %v3541_v62  ;;  %1658 = vmax.xlane.f32.xlu0 %v3584_v47  ;;  %v1520_v0 = vpop.f32.mrb[41].mxu1 }
 0x223   : > { %1660 = vmax.xlane.f32.xlu1 %v3590_v24  ;;  %v2764_v48 = vpop.f32.mrb[42].mxu1  ;;  %v1521_v1 = vadd.f32 %v3541_v62, %v1520_v0 }
 0x224   : > { %v1532_v59 = vadd.f32 %v2764_v48, %v3541_v62  ;;  %v1523_v60 = vpop.f32.mrb[43].mxu1  ;;  %v3596_v25 = vsel %vm1617_vm2, %v1529_v54, -1e+30  ;;  %v3698_v48 = vpop.permute.xlu0 %1919 }
 0x225   : > { %v1524_v49 = vadd.f32 %v3541_v62, %v1523_v60  ;;  %v3608_v4 = vsel %vm1617_vm2, %v1521_v1, -1e+30  ;;  %vm2006_vm8 = vcmp.eq.s32.totalorder %v3536_v13, %v3698_v48 }
 0x226   : > { %1670 = vmax.xlane.f32.xlu0 %v3596_v25  ;;  %v3603_v2 = vsel %vm1617_vm2, %v1532_v59, -1e+30 }
 0x227   : > { %1672 = vmax.xlane.f32.xlu1 %v3603_v2  ;;  %v3614_v5 = vsel %vm1617_vm2, %v1524_v49, -1e+30 }
 0x229   : > { %v2767_v3 = vpop.f32.mrb[44].mxu1 }
 0x22a   : > { %v1545_v28 = vadd.f32 %v2767_v3, %v3541_v62  ;;  %1666 = vmax.xlane.f32.xlu0 %v3608_v4  ;;  %v1536_v6 = vpop.f32.mrb[45].mxu1 }
 0x22b   : > { %1668 = vmax.xlane.f32.xlu1 %v3614_v5  ;;  %v2768_v30 = vpop.f32.mrb[46].mxu1  ;;  %v1537_v12 = vadd.f32 %v3541_v62, %v1536_v6 }
 0x22c   : > { %v1548_v10 = vadd.f32 %v2768_v30, %v3541_v62  ;;  %v1539_v11 = vpop.f32.mrb[47].mxu1  ;;  %v3620_v7 = vsel %vm1617_vm2, %v1545_v28, -1e+30 }
 0x22d   : > { %v1540_v31 = vadd.f32 %v3541_v62, %v1539_v11  ;;  %v3632_v19 = vsel %vm1617_vm2, %v1537_v12, -1e+30 }
 0x22e   : > { %1678 = vmax.xlane.f32.xlu0 %v3620_v7  ;;  %v3627_v14 = vsel %vm1617_vm2, %v1548_v10, -1e+30  ;;  %v3718_v10 = vpop.permute.xlu0 %1925 }
 0x22f   : > { %1680 = vmax.xlane.f32.xlu1 %v3627_v14  ;;  %v3638_v20 = vsel %vm1617_vm2, %v1540_v31, -1e+30  ;;  %vm2008_vm7 = vcmp.eq.s32.totalorder %v3536_v13, %v3718_v10 }
 0x231   : > { %v2771_v18 = vpop.f32.mrb[48].mxu1 }
 0x232   : > { %v1561_v34 = vadd.f32 %v2771_v18, %v3541_v62  ;;  %1674 = vmax.xlane.f32.xlu0 %v3632_v19  ;;  %v1552_v8 = vpop.f32.mrb[49].mxu1 }
 0x233   : > { %1676 = vmax.xlane.f32.xlu1 %v3638_v20  ;;  %v2772_v53 = vpop.f32.mrb[50].mxu1  ;;  %v1553_v26 = vadd.f32 %v3541_v62, %v1552_v8 }
 0x234   : > { %v1564_v22 = vadd.f32 %v2772_v53, %v3541_v62  ;;  %v1555_v9 = vpop.f32.mrb[51].mxu1  ;;  %v3644_v50 = vsel %vm1617_vm2, %v1561_v34, -1e+30 }
 0x235   : > { %v1556_v55 = vadd.f32 %v3541_v62, %v1555_v9  ;;  %v3658_v32 = vsel %vm1617_vm2, %v1553_v26, -1e+30  ;;  %v3736_v9 = vpop.permute.xlu0 %1931 }
 0x236   : > { %1686 = vmax.xlane.f32.xlu0 %v3644_v50  ;;  %v3651_v52 = vsel %vm1617_vm2, %v1564_v22, -1e+30  ;;  %v3734_v22 = vpop.permute.xlu1 %1907  ;;  %vm2010_vm12 = vcmp.eq.s32.totalorder %v3536_v13, %v3736_v9 }
 0x237   : > { %1688 = vmax.xlane.f32.xlu1 %v3651_v52  ;;  %v3664_v33 = vsel %vm1617_vm2, %v1556_v55, -1e+30  ;;  %vm2002_vm4 = vcmp.eq.s32.totalorder %v3536_v13, %v3734_v22 }
 0x239   : > { %v2775_v29 = vpop.f32.mrb[52].mxu1 }
 0x23a   : > { %v1577_v58 = vadd.f32 %v2775_v29, %v3541_v62  ;;  %1682 = vmax.xlane.f32.xlu0 %v3658_v32  ;;  %v1568_v35 = vpop.f32.mrb[53].mxu1  ;;  %v3748_v55 = vpop.permute.xlu1 %1916 }
 0x23b   : > { %1684 = vmax.xlane.f32.xlu1 %v3664_v33  ;;  %v2776_v56 = vpop.f32.mrb[54].mxu1  ;;  %v1569_v38 = vadd.f32 %v3541_v62, %v1568_v35  ;;  %v3750_v29 = vpop.permute.xlu0 %1937  ;;  %vm2005_vm5 = vcmp.eq.s32.totalorder %v3536_v13, %v3748_v55 }
 0x23c   : > { %v1580_v15 = vadd.f32 %v2776_v56, %v3541_v62  ;;  %v1571_v36 = vpop.f32.mrb[55].mxu1  ;;  %v3670_v37 = vsel %vm1617_vm2, %v1577_v58, -1e+30  ;;  %vm2012_vm11 = vcmp.eq.s32.totalorder %v3536_v13, %v3750_v29 }
 0x23d   : > { %v1572_v16 = vadd.f32 %v3541_v62, %v1571_v36  ;;  %v3684_v61 = vsel %vm1617_vm2, %v1569_v38, -1e+30 }
 0x23e   : > { %1694 = vmax.xlane.f32.xlu0 %v3670_v37  ;;  %v3677_v41 = vsel %vm1617_vm2, %v1580_v15, -1e+30  ;;  %v3752_v58 = vpop.permute.xlu1 %1922 }
 0x23f   : > { %1696 = vmax.xlane.f32.xlu1 %v3677_v41  ;;  %v3690_v63 = vsel %vm1617_vm2, %v1572_v16, -1e+30  ;;  %v3754_v35 = vpop.permute.xlu0 %1943  ;;  %vm2007_vm10 = vcmp.eq.s32.totalorder %v3536_v13, %v3752_v58 }
 0x240   : > { %vm2014_vm0 = vcmp.eq.s32.totalorder %v3536_v13, %v3754_v35 }
 0x241   : > { %v2779_v43 = vpop.f32.mrb[56].mxu1 }
 0x242   : > { %v1593_v44 = vadd.f32 %v2779_v43, %v3541_v62  ;;  %1690 = vmax.xlane.f32.xlu0 %v3684_v61  ;;  %v1584_v46 = vpop.f32.mrb[57].mxu1  ;;  %v3756_v56 = vpop.permute.xlu1 %1928 }
 0x243   : > { %1692 = vmax.xlane.f32.xlu1 %v3690_v63  ;;  %v2780_v45 = vpop.f32.mrb[58].mxu1  ;;  %v1585_v59 = vadd.f32 %v3541_v62, %v1584_v46  ;;  %v3758_v15 = vpop.permute.xlu0 %1949  ;;  %vm2009_vm9 = vcmp.eq.s32.totalorder %v3536_v13, %v3756_v56 }
 0x244   : > { %v1596_v51 = vadd.f32 %v2780_v45, %v3541_v62  ;;  %v1587_v54 = vpop.f32.mrb[59].mxu1  ;;  %v3696_v0 = vsel %vm1617_vm2, %v1593_v44, -1e+30  ;;  %vm2016_vm15 = vcmp.eq.s32.totalorder %v3536_v13, %v3758_v15 }
 0x245   : > { %v1588_v60 = vadd.f32 %v3541_v62, %v1587_v54  ;;  %v3710_v3 = vsel %vm1617_vm2, %v1585_v59, -1e+30 }
 0x246   : > { %1702 = vmax.xlane.f32.xlu0 %v3696_v0  ;;  %v3705_v1 = vsel %vm1617_vm2, %v1596_v51, -1e+30  ;;  %v3760_v36 = vpop.permute.xlu1 %1934 }
 0x247   : > { %1704 = vmax.xlane.f32.xlu1 %v3705_v1  ;;  %v3716_v30 = vsel %vm1617_vm2, %v1588_v60, -1e+30  ;;  %v3762_v38 = vpop.permute.xlu0 %1955  ;;  %vm2011_vm14 = vcmp.eq.s32.totalorder %v3536_v13, %v3760_v36 }
 0x249   : > { %v2783_v49 = vpop.f32.mrb[60].mxu1 }
 0x24a   : > { %v1609_v28 = vadd.f32 %v2783_v49, %v3541_v62  ;;  %1698 = vmax.xlane.f32.xlu0 %v3710_v3  ;;  %v1600_v6 = vpop.f32.mrb[61].mxu1  ;;  %v3764_v16 = vpop.permute.xlu1 %1940 }
 0x24b   : > { %1700 = vmax.xlane.f32.xlu1 %v3716_v30  ;;  %v2784_v11 = vpop.f32.mrb[62].mxu1  ;;  %v1601_v34 = vadd.f32 %v3541_v62, %v1600_v6  ;;  %v3766_v43 = vpop.permute.xlu0 %1958  ;;  %vm2013_vm13 = vcmp.eq.s32.totalorder %v3536_v13, %v3764_v16 }
 0x24c   : > { %v1612_v12 = vadd.f32 %v2784_v11, %v3541_v62  ;;  %v1603_v31 = vpop.f32.mrb[63].mxu1  ;;  %v3724_v18 = vsel %vm1617_vm2, %v1609_v28, -1e+30 }
 0x24d   : > { %3960 = vst [vmem:[#allocation2_spill] sm:$0xff] %v3724_v18  ;;  %v1604_v8 = vadd.f32 %v3541_v62, %v1603_v31  ;;  %v3740_v26 = vsel %vm1617_vm2, %v1601_v34, -1e+30 }
 0x24e   : > { %1710 = vmax.xlane.f32.xlu0 %v3724_v18  ;;  %v3731_v53 = vsel %vm1617_vm2, %v1612_v12, -1e+30  ;;  %3962 = vst [vmem:[#allocation4_spill] sm:$0xff] %v3740_v26  ;;  %v3768_v44 = vpop.permute.xlu1 %1946 }
 0x24f   : > { %3961 = vst [vmem:[#allocation3_spill] sm:$0xff] %v3731_v53  ;;  %1712 = vmax.xlane.f32.xlu1 %v3731_v53  ;;  %v3745_v62 = vsel %vm1617_vm2, %v1604_v8, -1e+30  ;;  %v3770_v46 = vpop.permute.xlu0 %1964  ;;  %vm2015_vm2 = vcmp.eq.s32.totalorder %v3536_v13, %v3768_v44 }
 0x250   : > { %3963 = vst [vmem:[#allocation5_spill] sm:$0xff] %v3745_v62 }
 0x252   : > { %1706 = vmax.xlane.f32.xlu0 %v3740_v26  ;;  %v3772_v45 = vpop.permute.xlu1 %1952 }
 0x253   : > { %1708 = vmax.xlane.f32.xlu1 %v3745_v62  ;;  %v3774_v51 = vpop.permute.xlu0 %1967  ;;  %vm2017_vm1 = vcmp.eq.s32.totalorder %v3536_v13, %v3772_v45 }
 0x254   : > { %3964 = vst [vmem:[#allocation6_spill] sm:$0xff] %v3774_v51 }
 0x256   : > { %v3776_v54 = vpop.permute.xlu1 %1961 }
 0x257   : > { %v3778_v59 = vpop.permute.xlu0 %1970 }
 0x258   : > { %3965 = vst [vmem:[#allocation7_spill] sm:$0xff] %v3778_v59 }
 0x25a   : > { %v3780_v60 = vpop.permute.xlu1 %1976 }
 0x25b   : > { %3966 = vst [vmem:[#allocation8_spill] sm:$0xff] %v3780_v60  ;;  %v3782_v49 = vpop.permute.xlu0 %1973 }
 0x25c   : > { %3967 = vst [vmem:[#allocation9_spill] sm:$0xff] %v3782_v49 }
 0x25e   : > { %v3784_v28 = vpop.permute.xlu1 %1982 }
 0x25f   : > { %3968 = vst [vmem:[#allocation10_spill] sm:$0xff] %v3784_v28  ;;  %v3786_v6 = vpop.permute.xlu0 %1979 }
 0x260   : > { %3969 = vst [vmem:[#allocation11_spill] sm:$0xff] %v3786_v6 }
 0x262   : > { %v3788_v11 = vpop.permute.xlu1 %1988 }
 0x263   : > { %3970 = vst [vmem:[#allocation12_spill] sm:$0xff] %v3788_v11  ;;  %v3790_v12 = vpop.permute.xlu0 %1985 }
 0x264   : > { %3971 = vst [vmem:[#allocation13_spill] sm:$0xff] %v3790_v12 }
 0x266   : > { %v3792_v31 = vpop.permute.xlu1 %1997 }
 0x267   : > { %3972 = vst [vmem:[#allocation14_spill] sm:$0xff] %v3792_v31  ;;  %v3794_v34 = vpop.permute.xlu0 %1991 }
 0x268   : > { %3973 = vst [vmem:[#allocation15_spill] sm:$0xff] %v3794_v34 }
 0x26a   : > { %v3796_v8 = vpop.permute.xlu1 %2000 }
 0x26b   : > { %3974 = vst [vmem:[#allocation16_spill] sm:$0xff] %v3796_v8  ;;  %v3798_v53 = vpop.permute.xlu0 %1994 }
 0x26c   : > { %3975 = vst [vmem:[#allocation17_spill] sm:$0xff] %v3798_v53 }
 0x2a2   : > { %v1655_v59 = vpop.xlane.xlu1 %1654 }
 0x2a3   : > { %v1716_v62 = vsub.f32 %v3549_v57, %v1655_v59  ;;  %v1651_v60 = vpop.xlane.xlu0 %1650 }
 0x2a4   : > { %v1714_v28 = vsub.f32 %v3555_v39, %v1651_v60 }
 0x2a5   : > { %v1750_v26 = vmul.f32 1.442695, %v1716_v62 }
 0x2a6   : > { %v1746_v6 = vmul.f32 1.442695, %v1714_v28  ;;  %v1657_v51 = vpop.xlane.xlu1 %1656 }
 0x2a7   : > { %2884 = vpow2.f32 %v1750_v26  ;;  %v1717_v11 = vsub.f32 %v3560_v40, %v1657_v51  ;;  %v1653_v12 = vpop.xlane.xlu0 %1652 }
 0x2a8   : > { %2886 = vpow2.f32 %v1746_v6  ;;  %v1715_v8 = vsub.f32 %v3565_v17, %v1653_v12 }
 0x2a9   : > { %v1752_v31 = vmul.f32 1.442695, %v1717_v11 }
 0x2aa   : > { %v1748_v18 = vmul.f32 1.442695, %v1715_v8 }
 0x2ab   : > { %2888 = vpow2.f32 %v1752_v31  ;;  %v1663_v34 = vpop.xlane.xlu0 %1662 }
 0x2ac   : > { %v1665_v53 = vpop.xlane.xlu1 %1664  ;;  %v1720_v57 = vsub.f32 %v3572_v21, %v1663_v34  ;;  %2890 = vpow2.f32 %v1748_v18 }
 0x2ad   : > { %v1721_v39 = vsub.f32 %v3579_v23, %v1665_v53 }
 0x2ae   : > { %v1758_v26 = vmul.f32 1.442695, %v1720_v57 }
 0x2af   : > { %v1659_v59 = vpop.xlane.xlu0 %1658  ;;  %v1760_v28 = vmul.f32 1.442695, %v1721_v39 }
 0x2b0   : > { %v1718_v40 = vsub.f32 %v3584_v47, %v1659_v59  ;;  %v1661_v51 = vpop.xlane.xlu1 %1660  ;;  %2892 = vpow2.f32 %v1758_v26 }
 0x2b1   : > { %v2885_v49 = vpop.eup %2884  ;;  %v1719_v21 = vsub.f32 %v3590_v24, %v1661_v51  ;;  %2894 = vpow2.f32 %v1760_v28 }
 0x2b2   : > { %1814 = vadd.xlane.f32.xlu1 %v2885_v49  ;;  %v2887_v62 = vpop.eup %2886  ;;  %v1754_v17 = vmul.f32 1.442695, %v1718_v40  ;;  %v2036_v23 = vsel %vm2004_vm3, %v2885_v49, 0.0  ;;  %vm2020_vm3 = vcmp.eq.s32.totalorder %v3536_v13, %v3776_v54 }
 0x2b3   : > { %v1671_v6 = vpop.xlane.xlu0 %1670  ;;  %v2034_v18 = vsel %vm2002_vm4, %v2887_v62, 0.0  ;;  %v1756_v47 = vmul.f32 1.442695, %v1719_v21  ;;  %vm2018_vm4 = vcmp.eq.s32.totalorder %v3536_v13, %v3762_v38 }
 0x2b4   : > { %2896 = vpow2.f32 %v1754_v17  ;;  %v1724_v53 = vsub.f32 %v3596_v25, %v1671_v6  ;;  %v1673_v31 = vpop.xlane.xlu1 %1672 }
 0x2b5   : > { %v2889_v60 = vpop.eup %2888  ;;  %2898 = vpow2.f32 %v1756_v47  ;;  %v1725_v25 = vsub.f32 %v3603_v2, %v1673_v31 }
 0x2b6   : > { %1810 = vadd.xlane.f32.xlu1 %v2887_v62  ;;  %1816 = vadd.xlane.f32.xlu0 %v2889_v60  ;;  %v2891_v24 = vpop.eup %2890  ;;  %v2037_v12 = vsel %vm2005_vm5, %v2889_v60, 0.0  ;;  %v1766_v42 = vmul.f32 1.442695, %v1724_v53  ;;  %vm2021_vm5 = vcmp.eq.s32.totalorder %v3536_v13, %v3770_v46 }
 0x2b7   : > { %v1667_v11 = vpop.xlane.xlu0 %1666  ;;  %v2035_v34 = vsel %vm2003_vm6, %v2891_v24, 0.0  ;;  %v1768_v26 = vmul.f32 1.442695, %v1725_v25  ;;  %vm2019_vm6 = vcmp.eq.s32.totalorder %v3536_v13, %v3766_v43 }
 0x2b8   : > { %v1722_v22 = vsub.f32 %v3608_v4, %v1667_v11  ;;  %2900 = vpow2.f32 %v1766_v42  ;;  %v1669_v57 = vpop.xlane.xlu1 %1668 }
 0x2b9   : > { %v1723_v4 = vsub.f32 %v3614_v5, %v1669_v57 }
 0x2ba   : > { %2070 = vadd.xlane.f32.xlu1 %v2036_v23  ;;  %2066 = vadd.xlane.f32.xlu0 %v2034_v18  ;;  %v2893_v49 = vpop.eup %2892  ;;  %v1762_v55 = vmul.f32 1.442695, %v1722_v22 }
 0x2bb   : > { %v2895_v8 = vpop.eup %2894  ;;  %v1679_v39 = vpop.xlane.xlu0 %1678  ;;  %v2040_v40 = vsel %vm2008_vm7, %v2893_v49, 0.0  ;;  %v1764_v2 = vmul.f32 1.442695, %v1723_v4 }
 0x2bc   : > { %2902 = vpow2.f32 %v1762_v55  ;;  %v1728_v62 = vsub.f32 %v3620_v7, %v1679_v39  ;;  %v1681_v6 = vpop.xlane.xlu1 %1680  ;;  %v2041_v21 = vsel %vm2009_vm9, %v2895_v8, 0.0 }
 0x2bd   : > { %2904 = vpow2.f32 %v1768_v26  ;;  %v1729_v7 = vsub.f32 %v3627_v14, %v1681_v6 }
 0x2be   : > { %2072 = vadd.xlane.f32.xlu1 %v2037_v12  ;;  %1812 = vadd.xlane.f32.xlu0 %v2891_v24  ;;  %v2897_v59 = vpop.eup %2896  ;;  %2906 = vpow2.f32 %v1764_v2  ;;  %v1774_v5 = vmul.f32 1.442695, %v1728_v62 }
 0x2bf   : > { %v2899_v27 = vpop.eup %2898  ;;  %v1675_v51 = vpop.xlane.xlu0 %1674  ;;  %v2038_v28 = vsel %vm2006_vm8, %v2897_v59, 0.0 }
 0x2c0   : > { %v1726_v10 = vsub.f32 %v3632_v19, %v1675_v51  ;;  %2908 = vpow2.f32 %v1774_v5  ;;  %v1677_v23 = vpop.xlane.xlu1 %1676  ;;  %v2039_v47 = vsel %vm2007_vm10, %v2899_v27, 0.0  ;;  %v1776_v19 = vmul.f32 1.442695, %v1729_v7 }
 0x2c1   : > { %v1727_v56 = vsub.f32 %v3638_v20, %v1677_v23 }
 0x2c2   : > { %2068 = vadd.xlane.f32.xlu1 %v2035_v34  ;;  %1822 = vadd.xlane.f32.xlu0 %v2893_v49  ;;  %v2901_v60 = vpop.eup %2900  ;;  %v1770_v48 = vmul.f32 1.442695, %v1726_v10 }
 0x2c3   : > { %v1687_v53 = vpop.xlane.xlu0 %1686  ;;  %v2044_v24 = vsel %vm2012_vm11, %v2901_v60, 0.0  ;;  %v1772_v14 = vmul.f32 1.442695, %v1727_v56 }
 0x2c4   : > { %2910 = vpow2.f32 %v1770_v48  ;;  %v1732_v58 = vsub.f32 %v3644_v50, %v1687_v53  ;;  %v1689_v22 = vpop.xlane.xlu1 %1688 }
 0x2c5   : > { %2912 = vpow2.f32 %v1776_v19  ;;  %v1733_v50 = vsub.f32 %v3651_v52, %v1689_v22 }
 0x2c6   : > { %1818 = vadd.xlane.f32.xlu1 %v2897_v59  ;;  %1824 = vadd.xlane.f32.xlu0 %v2895_v8  ;;  %v2903_v17 = vpop.eup %2902  ;;  %2914 = vpow2.f32 %v1772_v14  ;;  %v1782_v20 = vmul.f32 1.442695, %v1732_v58  ;;  %v3977_v58 = vld [vmem:[#allocation2_spill] sm:$0xff] }
 0x2c7   : > { %v2905_v18 = vpop.eup %2904  ;;  %v1683_v12 = vpop.xlane.xlu0 %1682  ;;  %v2042_v42 = vsel %vm2010_vm12, %v2903_v17, 0.0 }
 0x2c8   : > { %v2907_v11 = vpop.eup %2906  ;;  %v1730_v29 = vsub.f32 %v3658_v32, %v1683_v12  ;;  %v2045_v34 = vsel %vm2013_vm13, %v2905_v18, 0.0  ;;  %2916 = vpow2.f32 %v1782_v20  ;;  %v1685_v25 = vpop.xlane.xlu1 %1684  ;;  %v1784_v32 = vmul.f32 1.442695, %v1733_v50 }
 0x2c9   : > { %v2043_v8 = vsel %vm2011_vm14, %v2907_v11, 0.0  ;;  %v1731_v16 = vsub.f32 %v3664_v33, %v1685_v25 }
 0x2ca   : > { %2078 = vadd.xlane.f32.xlu1 %v2040_v40  ;;  %1820 = vadd.xlane.f32.xlu0 %v2899_v27  ;;  %v2909_v31 = vpop.eup %2908  ;;  %v1778_v9 = vmul.f32 1.442695, %v1730_v29  ;;  %v3979_v29 = vld [vmem:[#allocation4_spill] sm:$0xff] }
 0x2cb   : > { %v1695_v57 = vpop.xlane.xlu0 %1694  ;;  %v2048_v39 = vsel %vm2016_vm15, %v2909_v31, 0.0  ;;  %v1780_v52 = vmul.f32 1.442695, %v1731_v16 }
 0x2cc   : > { %2918 = vpow2.f32 %v1778_v9  ;;  %v1736_v36 = vsub.f32 %v3670_v37, %v1695_v57  ;;  %v1697_v40 = vpop.xlane.xlu1 %1696 }
 0x2cd   : > { %2920 = vpow2.f32 %v1784_v32  ;;  %v1737_v37 = vsub.f32 %v3677_v41, %v1697_v40  ;;  %v3982_v32 = vld [vmem:[#allocation7_spill] sm:$0xff] }
 0x2ce   : > { %2074 = vadd.xlane.f32.xlu1 %v2038_v28  ;;  %1830 = vadd.xlane.f32.xlu0 %v2901_v60  ;;  %v2911_v49 = vpop.eup %2910  ;;  %2922 = vpow2.f32 %v1780_v52  ;;  %v1790_v33 = vmul.f32 1.442695, %v1736_v36  ;;  %vm2023_vm10 = vcmp.eq.s32.totalorder %v3536_v13, %v3982_v32 }
 0x2cf   : > { %v2913_v55 = vpop.eup %2912  ;;  %v1691_v26 = vpop.xlane.xlu0 %1690  ;;  %v2046_v27 = vsel %vm2014_vm0, %v2911_v49, 0.0 }
 0x2d0   : > { %v2915_v59 = vpop.eup %2914  ;;  %v1734_v15 = vsub.f32 %v3684_v61, %v1691_v26  ;;  %v2049_v62 = vsel %vm2017_vm1, %v2913_v55, 0.0  ;;  %2924 = vpow2.f32 %v1790_v33  ;;  %v1693_v51 = vpop.xlane.xlu1 %1692  ;;  %v1792_v61 = vmul.f32 1.442695, %v1737_v37  ;;  %v3984_v26 = vld [vmem:[#allocation11_spill] sm:$0xff]  ;;  %v3985_v33 = vld [vmem:[#allocation10_spill] sm:$0xff] }
 0x2d1   : > { %v2047_v28 = vsel %vm2015_vm2, %v2915_v59, 0.0  ;;  %v1735_v45 = vsub.f32 %v3690_v63, %v1693_v51  ;;  %vm2026_vm11 = vcmp.eq.s32.totalorder %v3536_v13, %v3984_v26  ;;  %vm2027_vm12 = vcmp.eq.s32.totalorder %v3536_v13, %v3985_v33  ;;  %v3987_v51 = vld [vmem:[#allocation15_spill] sm:$0xff] }
 0x2d2   : > { %2080 = vadd.xlane.f32.xlu1 %v2041_v21  ;;  %1826 = vadd.xlane.f32.xlu0 %v2903_v17  ;;  %v2917_v4 = vpop.eup %2916  ;;  %v1786_v35 = vmul.f32 1.442695, %v1734_v15  ;;  %vm2030_vm14 = vcmp.eq.s32.totalorder %v3536_v13, %v3987_v51 }
 0x2d3   : > { %v1703_v6 = vpop.xlane.xlu0 %1702  ;;  %v2052_v10 = vsel %vm2020_vm3, %v2917_v4, 0.0  ;;  %v1788_v41 = vmul.f32 1.442695, %v1735_v45  ;;  %vm2290_vm3 = vcmask 7168  }
 0x2d4   : > { %2926 = vpow2.f32 %v1786_v35  ;;  %v1740_v44 = vsub.f32 %v3696_v0, %v1703_v6  ;;  %v1705_v48 = vpop.xlane.xlu1 %1704  ;;  %v3988_v6 = vld [vmem:[#allocation14_spill] sm:$0xff] }
 0x2d5   : > { %2928 = vpow2.f32 %v1792_v61  ;;  %v1741_v0 = vsub.f32 %v3705_v1, %v1705_v48  ;;  %vm2032_vm15 = vcmp.eq.s32.totalorder %v3536_v13, %v3988_v6 }
 0x2d6   : > { %2076 = vadd.xlane.f32.xlu1 %v2039_v47  ;;  %1832 = vadd.xlane.f32.xlu0 %v2905_v18  ;;  %v2919_v2 = vpop.eup %2918  ;;  %2930 = vpow2.f32 %v1788_v41  ;;  %v1798_v63 = vmul.f32 1.442695, %v1740_v44  ;;  %v3990_v41 = vld [vmem:[#allocation17_spill] sm:$0xff] }
 0x2d7   : > { %v2921_v60 = vpop.eup %2920  ;;  %v1699_v17 = vpop.xlane.xlu0 %1698  ;;  %v2050_v7 = vsel %vm2018_vm4, %v2919_v2, 0.0  ;;  %vm2031_vm1 = vcmp.eq.s32.totalorder %v3536_v13, %v3990_v41 }
 0x2d8   : > { %v2923_v5 = vpop.eup %2922  ;;  %v1738_v54 = vsub.f32 %v3710_v3, %v1699_v17  ;;  %v2053_v18 = vsel %vm2021_vm5, %v2921_v60, 0.0  ;;  %2932 = vpow2.f32 %v1798_v63  ;;  %v1701_v47 = vpop.xlane.xlu1 %1700  ;;  %v1800_v3 = vmul.f32 1.442695, %v1741_v0  ;;  %v3991_v17 = vld [vmem:[#allocation16_spill] sm:$0xff] }
 0x2d9   : > { %v2051_v19 = vsel %vm2019_vm6, %v2923_v5, 0.0  ;;  %v1739_v46 = vsub.f32 %v3716_v30, %v1701_v47  ;;  %vm2033_vm2 = vcmp.eq.s32.totalorder %v3536_v13, %v3991_v17 }
 0x2da   : > { %2086 = vadd.xlane.f32.xlu1 %v2044_v24  ;;  %1828 = vadd.xlane.f32.xlu0 %v2907_v11  ;;  %v2925_v21 = vpop.eup %2924  ;;  %v1794_v38 = vmul.f32 1.442695, %v1738_v54  ;;  %v3976_v11 = vld [vmem:[#allocation9_spill] sm:$0xff] }
 0x2db   : > { %v1711_v56 = vpop.xlane.xlu0 %1710  ;;  %vm2024_vm7 = vcmp.eq.s32.totalorder %v3536_v13, %v3976_v11  ;;  %v1796_v43 = vmul.f32 1.442695, %v1739_v46 }
 0x2dc   : > { %2934 = vpow2.f32 %v1794_v38  ;;  %v2056_v14 = vsel %vm2024_vm7, %v2925_v21, 0.0  ;;  %v1713_v1 = vpop.xlane.xlu1 %1712  ;;  %v1744_v12 = vsub.f32 %v3977_v58, %v1711_v56 }
 0x2dd   : > { %2936 = vpow2.f32 %v1800_v3 }
 0x2de   : > { %2082 = vadd.xlane.f32.xlu1 %v2042_v42  ;;  %1838 = vadd.xlane.f32.xlu0 %v2909_v31  ;;  %v2927_v23 = vpop.eup %2926  ;;  %v3978_v31 = vld [vmem:[#allocation6_spill] sm:$0xff]  ;;  %2938 = vpow2.f32 %v1796_v43  ;;  %v1806_v30 = vmul.f32 1.442695, %v1744_v12 }
 0x2df   : > { %v2929_v53 = vpop.eup %2928  ;;  %vm2022_vm8 = vcmp.eq.s32.totalorder %v3536_v13, %v3978_v31  ;;  %v1707_v42 = vpop.xlane.xlu0 %1706 }
 0x2e0   : > { %v2931_v24 = vpop.eup %2930  ;;  %v2054_v20 = vsel %vm2022_vm8, %v2927_v23, 0.0  ;;  %v1709_v50 = vpop.xlane.xlu1 %1708  ;;  %2940 = vpow2.f32 %v1806_v30 }
 0x2e2   : > { %2088 = vadd.xlane.f32.xlu1 %v2045_v34  ;;  %1834 = vadd.xlane.f32.xlu0 %v2911_v49  ;;  %v2933_v22 = vpop.eup %2932  ;;  %v1742_v49 = vsub.f32 %v3979_v29, %v1707_v42  ;;  %v3980_v34 = vld [vmem:[#allocation8_spill] sm:$0xff] }
 0x2e3   : > { %vm2025_vm9 = vcmp.eq.s32.totalorder %v3536_v13, %v3980_v34 }
 0x2e4   : > { %v2057_v25 = vsel %vm2025_vm9, %v2929_v53, 0.0 }
 0x2e6   : > { %2084 = vadd.xlane.f32.xlu1 %v2043_v8  ;;  %1840 = vadd.xlane.f32.xlu0 %v2913_v55  ;;  %v2935_v9 = vpop.eup %2934  ;;  %v1802_v55 = vmul.f32 1.442695, %v1742_v49  ;;  %v3981_v8 = vld [vmem:[#allocation5_spill] sm:$0xff] }
 0x2e7   : > { %v1743_v57 = vsub.f32 %v3981_v8, %v1709_v50  ;;  %v2937_v16 = vpop.eup %2936 }
 0x2e8   : > { %2942 = vpow2.f32 %v1802_v55 }
 0x2e9   : > { %v1804_v36 = vmul.f32 1.442695, %v1743_v57 }
 0x2ea   : > { %2094 = vadd.xlane.f32.xlu1 %v2048_v39  ;;  %1836 = vadd.xlane.f32.xlu0 %v2915_v59  ;;  %v2055_v59 = vsel %vm2023_vm10, %v2931_v24, 0.0  ;;  %v3983_v39 = vld [vmem:[#allocation3_spill] sm:$0xff] }
 0x2eb   : > { %v1745_v52 = vsub.f32 %v3983_v39, %v1713_v1  ;;  %2944 = vpow2.f32 %v1804_v36 }
 0x2ed   : > { %v1808_v40 = vmul.f32 1.442695, %v1745_v52 }
 0x2ee   : > { %2090 = vadd.xlane.f32.xlu1 %v2046_v27  ;;  %1846 = vadd.xlane.f32.xlu0 %v2917_v4  ;;  %v2939_v4 = vpop.eup %2938  ;;  %v2058_v27 = vsel %vm2026_vm11, %v2935_v9, 0.0 }
 0x2ef   : > { %v2941_v15 = vpop.eup %2940  ;;  %2946 = vpow2.f32 %v1808_v40 }
 0x2f0   : > { %v2064_v45 = vsel %vm2032_vm15, %v2941_v15, 0.0 }
 0x2f2   : > { %2096 = vadd.xlane.f32.xlu1 %v2049_v62  ;;  %1842 = vadd.xlane.f32.xlu0 %v2919_v2  ;;  %v2059_v2 = vsel %vm2027_vm12, %v2939_v4, 0.0  ;;  %v3986_v62 = vld [vmem:[#allocation13_spill] sm:$0xff]  ;;  %v2943_v37 = vpop.eup %2942 }
 0x2f3   : > { %vm2028_vm13 = vcmp.eq.s32.totalorder %v3536_v13, %v3986_v62 }
 0x2f4   : > { %v2060_v35 = vsel %vm2028_vm13, %v2933_v22, 0.0 }
 0x2f6   : > { %2092 = vadd.xlane.f32.xlu1 %v2047_v28  ;;  %1848 = vadd.xlane.f32.xlu0 %v2921_v60  ;;  %v2945_v60 = vpop.eup %2944  ;;  %v2062_v28 = vsel %vm2030_vm14, %v2943_v37, 0.0 }
 0x2f7   : > { %v2063_v44 = vsel %vm2031_vm1, %v2945_v60, 0.0 }
 0x2f9   : > { %v2947_v61 = vpop.eup %2946 }
 0x2fa   : > { %2102 = vadd.xlane.f32.xlu1 %v2052_v10  ;;  %1844 = vadd.xlane.f32.xlu0 %v2923_v5  ;;  %v3989_v5 = vld [vmem:[#allocation12_spill] sm:$0xff] }
 0x2fb   : > { %vm2029_vm0 = vcmp.eq.s32.totalorder %v3536_v13, %v3989_v5 }
 0x2fc   : > { %v2061_v10 = vsel %vm2029_vm0, %v2937_v16, 0.0 }
 0x2fe   : > { %2098 = vadd.xlane.f32.xlu1 %v2050_v7  ;;  %1854 = vadd.xlane.f32.xlu0 %v2925_v21  ;;  %v2065_v21 = vsel %vm2033_vm2, %v2947_v61, 0.0 }
 0x302   : > { %2104 = vadd.xlane.f32.xlu1 %v2053_v18  ;;  %1850 = vadd.xlane.f32.xlu0 %v2927_v23 }
 0x306   : > { %2100 = vadd.xlane.f32.xlu1 %v2051_v19  ;;  %1856 = vadd.xlane.f32.xlu0 %v2929_v53 }
 0x30a   : > { %2110 = vadd.xlane.f32.xlu1 %v2056_v14  ;;  %1852 = vadd.xlane.f32.xlu0 %v2931_v24 }
 0x30e   : > { %2106 = vadd.xlane.f32.xlu1 %v2054_v20  ;;  %1862 = vadd.xlane.f32.xlu0 %v2933_v22 }
 0x312   : > { %2112 = vadd.xlane.f32.xlu1 %v2057_v25  ;;  %1858 = vadd.xlane.f32.xlu0 %v2935_v9 }
 0x316   : > { %2108 = vadd.xlane.f32.xlu1 %v2055_v59  ;;  %1864 = vadd.xlane.f32.xlu0 %v2937_v16 }
 0x31a   : > { %2114 = vadd.xlane.f32.xlu1 %v2058_v27  ;;  %1860 = vadd.xlane.f32.xlu0 %v2939_v4 }
 0x31e   : > { %2116 = vadd.xlane.f32.xlu1 %v2059_v2  ;;  %1870 = vadd.xlane.f32.xlu0 %v2941_v15 }
 0x322   : > { %2118 = vadd.xlane.f32.xlu1 %v2060_v35  ;;  %1866 = vadd.xlane.f32.xlu0 %v2943_v37 }
 0x326   : > { %1868 = vadd.xlane.f32.xlu0 %v2945_v60  ;;  %2122 = vadd.xlane.f32.xlu1 %v2062_v28 }
 0x32a   : > { %1872 = vadd.xlane.f32.xlu0 %v2947_v61  ;;  %2126 = vadd.xlane.f32.xlu1 %v2064_v45 }
 0x32e   : > { %2120 = vadd.xlane.f32.xlu0 %v2061_v10 }
 0x332   : > { %2124 = vadd.xlane.f32.xlu0 %v2063_v44 }
 0x336   : > { %2128 = vadd.xlane.f32.xlu0 %v2065_v21 }
 0x33f   : > { %v1815_v7 = vpop.xlane.xlu1 %1814 }
 0x343   : > { %v1811_v48 = vpop.xlane.xlu1 %1810  ;;  %v1817_v63 = vpop.xlane.xlu0 %1816 }
 0x347   : > { %v2071_v54 = vpop.xlane.xlu1 %2070  ;;  %v2067_v23 = vpop.xlane.xlu0 %2066 }
 0x34b   : > { %v2073_v18 = vpop.xlane.xlu1 %2072  ;;  %v1813_v0 = vpop.xlane.xlu0 %1812 }
 0x34c   : > { %2948 = vrcp.f32 %v1813_v0 }
 0x34d   : > { %2950 = vrcp.f32 %v1811_v48 }
 0x34e   : > { %2952 = vrcp.f32 %v1815_v7 }
 0x34f   : > { %v2069_v38 = vpop.xlane.xlu1 %2068  ;;  %v1823_v47 = vpop.xlane.xlu0 %1822  ;;  %2954 = vrcp.f32 %v1817_v63 }
 0x353   : > { %v1819_v53 = vpop.xlane.xlu1 %1818  ;;  %v1825_v19 = vpop.xlane.xlu0 %1824 }
 0x354   : > { %2956 = vrcp.f32 %v1819_v53 }
 0x356   : > { %v2949_v13 = vpop.eup %2948 }
 0x357   : > { %v2079_v56 = vpop.xlane.xlu1 %2078  ;;  %v1821_v3 = vpop.xlane.xlu0 %1820  ;;  %v2163_v43 = vmul.f32 %v2949_v13, %v2069_v38 }
 0x358   : > { %v2951_v1 = vpop.eup %2950  ;;  %2958 = vrcp.f32 %v1821_v3 }
 0x359   : > { %v2162_v31 = vmul.f32 %v2951_v1, %v2067_v23  ;;  %v2953_v42 = vpop.eup %2952  ;;  %v2195_v22 = vadd.f32 0.0001, %v2163_v43  ;;  %2960 = vrcp.f32 %v1823_v47 }
 0x35a   : > { %v2955_v49 = vpop.eup %2954  ;;  %v2164_v34 = vmul.f32 %v2953_v42, %v2071_v54  ;;  %2962 = vrcp.f32 %v1825_v19 }
 0x35b   : > { %v2075_v46 = vpop.xlane.xlu1 %2074  ;;  %v1831_v11 = vpop.xlane.xlu0 %1830  ;;  %v2194_v29 = vadd.f32 0.0001, %v2162_v31  ;;  %2964 = vlog2.f32 %v2195_v22  ;;  %v2165_v8 = vmul.f32 %v2955_v49, %v2073_v18 }
 0x35c   : > { %v2196_v57 = vadd.f32 0.0001, %v2164_v34 }
 0x35d   : > { %v2197_v52 = vadd.f32 0.0001, %v2165_v8 }
 0x35e   : > { %v2957_v50 = vpop.eup %2956 }
 0x35f   : > { %v2081_v24 = vpop.xlane.xlu1 %2080  ;;  %v1827_v14 = vpop.xlane.xlu0 %1826  ;;  %v2166_v32 = vmul.f32 %v2957_v50, %v2075_v46 }
 0x360   : > { %2966 = vrcp.f32 %v1827_v14 }
 0x361   : > { %2968 = vlog2.f32 %v2194_v29  ;;  %v2198_v26 = vadd.f32 0.0001, %v2166_v32 }
 0x362   : > { %v2959_v55 = vpop.eup %2958 }
 0x363   : > { %v2077_v58 = vpop.xlane.xlu1 %2076  ;;  %v1833_v12 = vpop.xlane.xlu0 %1832 }
 0x364   : > { %v2167_v16 = vmul.f32 %v2959_v55, %v2077_v58  ;;  %v2961_v36 = vpop.eup %2960 }
 0x365   : > { %v2963_v4 = vpop.eup %2962  ;;  %v2168_v2 = vmul.f32 %v2961_v36, %v2079_v56 }
 0x366   : > { %v2199_v27 = vadd.f32 0.0001, %v2167_v16  ;;  %v2965_v15 = vpop.eup %2964  ;;  %v2169_v35 = vmul.f32 %v2963_v4, %v2081_v24 }
 0x367   : > { %v3896_v20 = vpop.xlane.xlu1 %2086  ;;  %v1829_v30 = vpop.xlane.xlu0 %1828  ;;  %v2229_v6 = vmul.f32 0.6931472, %v2965_v15  ;;  %v2200_v61 = vadd.f32 0.0001, %v2168_v2 }
 0x368   : > { %2970 = vrcp.f32 %v1829_v30  ;;  %v2201_v10 = vadd.f32 0.0001, %v2169_v35 }
 0x369   : > { %2972 = vlog2.f32 %v2196_v57  ;;  %v2292_v7 = vsel %vm2290_vm3, %v2229_v6, 0.0 }
 0x36a   : > { %2974 = vrcp.f32 %v1831_v11  ;;  %v2967_v62 = vpop.eup %2966 }
 0x36b   : > { %v2083_v9 = vpop.xlane.xlu1 %2082  ;;  %v1839_v25 = vpop.xlane.xlu0 %1838  ;;  %2976 = vlog2.f32 %v2197_v52 }
 0x36c   : > { %2978 = vlog2.f32 %v2198_v26  ;;  %v2969_v37 = vpop.eup %2968  ;;  %v2170_v45 = vmul.f32 %v2967_v62, %v2083_v9 }
 0x36d   : > { %2980 = vrcp.f32 %v1833_v12  ;;  %v2227_v5 = vmul.f32 0.6931472, %v2969_v37 }
 0x36e   : > { %2982 = vlog2.f32 %v2199_v27  ;;  %v2202_v48 = vadd.f32 0.0001, %v2170_v45 }
 0x36f   : > { %v3898_v59 = vpop.xlane.xlu1 %2088  ;;  %v1835_v39 = vpop.xlane.xlu0 %1834  ;;  %v2291_v18 = vsel %vm2290_vm3, %v2227_v5, 0.0 }
 0x370   : > { %2984 = vrcp.f32 %v1835_v39  ;;  %v2293_v47 = vadd.f32 %v2292_v7, %v2291_v18 }
 0x372   : > { %v2971_v51 = vpop.eup %2970 }
 0x373   : > { %v2085_v40 = vpop.xlane.xlu1 %2084  ;;  %v1841_v33 = vpop.xlane.xlu0 %1840 }
 0x374   : > { %v2171_v41 = vmul.f32 %v2971_v51, %v2085_v40  ;;  %v2973_v44 = vpop.eup %2972 }
 0x375   : > { %v2975_v63 = vpop.eup %2974  ;;  %v2231_v23 = vmul.f32 0.6931472, %v2973_v44 }
 0x376   : > { %v2977_v54 = vpop.eup %2976  ;;  %v2203_v0 = vadd.f32 0.0001, %v2171_v41  ;;  %v2172_v3 = vmul.f32 %v2975_v63, %v3896_v20 }
 0x377   : > { %v3900_v60 = vpop.xlane.xlu1 %2094  ;;  %v1837_v28 = vpop.xlane.xlu0 %1836  ;;  %v2294_v13 = vsel %vm2290_vm3, %v2231_v23, 0.0  ;;  %v2233_v24 = vmul.f32 0.6931472, %v2977_v54 }
 0x378   : > { %2986 = vrcp.f32 %v1837_v28  ;;  %v2979_v38 = vpop.eup %2978  ;;  %v2295_v1 = vadd.f32 %v2294_v13, %v2293_v47  ;;  %v2204_v42 = vadd.f32 0.0001, %v2172_v3 }
 0x379   : > { %2988 = vlog2.f32 %v2200_v61  ;;  %v2981_v56 = vpop.eup %2980  ;;  %v2235_v14 = vmul.f32 0.6931472, %v2979_v38  ;;  %v2296_v29 = vsel %vm2290_vm3, %v2233_v24, 0.0 }
 0x37a   : > { %2990 = vlog2.f32 %v2201_v10  ;;  %v2983_v46 = vpop.eup %2982  ;;  %v2173_v22 = vmul.f32 %v2981_v56, %v3898_v59  ;;  %v2297_v34 = vadd.f32 %v2296_v29, %v2295_v1 }
 0x37b   : > { %v2091_v17 = vpop.xlane.xlu1 %2090  ;;  %v1847_v21 = vpop.xlane.xlu0 %1846  ;;  %2992 = vrcp.f32 %v1839_v25  ;;  %v2237_v31 = vmul.f32 0.6931472, %v2983_v46  ;;  %v2298_v49 = vsel %vm2290_vm3, %v2235_v14, 0.0 }
 0x37c   : > { %2994 = vlog2.f32 %v2202_v48  ;;  %v2985_v11 = vpop.eup %2984  ;;  %v2205_v57 = vadd.f32 0.0001, %v2173_v22  ;;  %v2299_v39 = vadd.f32 %v2298_v49, %v2297_v34 }
 0x37d   : > { %2996 = vrcp.f32 %v1841_v33  ;;  %v2174_v30 = vmul.f32 %v2985_v11, %v2091_v17  ;;  %v2300_v8 = vsel %vm2290_vm3, %v2237_v31, 0.0 }
 0x37e   : > { %2998 = vlog2.f32 %v2203_v0  ;;  %v2301_v26 = vadd.f32 %v2300_v8, %v2299_v39 }
 0x37f   : > { %v2097_v53 = vpop.xlane.xlu1 %2096  ;;  %v1843_v19 = vpop.xlane.xlu0 %1842  ;;  %v2206_v52 = vadd.f32 0.0001, %v2174_v30 }
 0x380   : > { %3000 = vrcp.f32 %v1843_v19 }
 0x381   : > { %3002 = vlog2.f32 %v2204_v42 }
 0x382   : > { %v2987_v12 = vpop.eup %2986 }
 0x383   : > { %v2093_v43 = vpop.xlane.xlu1 %2092  ;;  %v1849_v58 = vpop.xlane.xlu0 %1848 }
 0x384   : > { %v2989_v20 = vpop.eup %2988  ;;  %v2175_v50 = vmul.f32 %v2987_v12, %v2093_v43 }
 0x385   : > { %v2991_v55 = vpop.eup %2990  ;;  %v2239_v16 = vmul.f32 0.6931472, %v2989_v20 }
 0x386   : > { %v2993_v32 = vpop.eup %2992  ;;  %v2207_v4 = vadd.f32 0.0001, %v2175_v50  ;;  %v2241_v37 = vmul.f32 0.6931472, %v2991_v55 }
 0x387   : > { %v2103_v9 = vpop.xlane.xlu1 %2102  ;;  %v1845_v25 = vpop.xlane.xlu0 %1844  ;;  %v2176_v15 = vmul.f32 %v2993_v32, %v3900_v60  ;;  %v2302_v62 = vsel %vm2290_vm3, %v2239_v16, 0.0 }
 0x388   : > { %3004 = vrcp.f32 %v1845_v25  ;;  %v2995_v59 = vpop.eup %2994  ;;  %v2303_v28 = vadd.f32 %v2302_v62, %v2301_v26  ;;  %v2304_v44 = vsel %vm2290_vm3, %v2241_v37, 0.0 }
 0x389   : > { %v2997_v36 = vpop.eup %2996  ;;  %3006 = vrcp.f32 %v1847_v21  ;;  %v2243_v35 = vmul.f32 0.6931472, %v2995_v59  ;;  %v2208_v5 = vadd.f32 0.0001, %v2176_v15 }
 0x38a   : > { %v2999_v33 = vpop.eup %2998  ;;  %3008 = vlog2.f32 %v2205_v57  ;;  %v2177_v51 = vmul.f32 %v2997_v36, %v2097_v53  ;;  %v2305_v7 = vadd.f32 %v2304_v44, %v2303_v28 }
 0x38b   : > { %v2099_v27 = vpop.xlane.xlu1 %2098  ;;  %v1855_v40 = vpop.xlane.xlu0 %1854  ;;  %3010 = vlog2.f32 %v2206_v52  ;;  %v2245_v45 = vmul.f32 0.6931472, %v2999_v33  ;;  %v2306_v60 = vsel %vm2290_vm3, %v2243_v35, 0.0 }
 0x38c   : > { %v3001_v2 = vpop.eup %3000  ;;  %3012 = vrcp.f32 %v1849_v58  ;;  %v2209_v17 = vadd.f32 0.0001, %v2177_v51  ;;  %v2307_v38 = vadd.f32 %v2306_v60, %v2305_v7 }
 0x38d   : > { %3014 = vlog2.f32 %v2207_v4  ;;  %v2178_v10 = vmul.f32 %v3001_v2, %v2099_v27  ;;  %v3003_v41 = vpop.eup %3002  ;;  %v2308_v54 = vsel %vm2290_vm3, %v2245_v45, 0.0 }
 0x38e   : > { %v2247_v53 = vmul.f32 0.6931472, %v3003_v41  ;;  %v2309_v56 = vadd.f32 %v2308_v54, %v2307_v38 }
 0x38f   : > { %v2105_v6 = vpop.xlane.xlu1 %2104  ;;  %v1851_v61 = vpop.xlane.xlu0 %1850  ;;  %v2210_v23 = vadd.f32 0.0001, %v2178_v10 }
 0x390   : > { %3016 = vrcp.f32 %v1851_v61  ;;  %v2310_v1 = vsel %vm2290_vm3, %v2247_v53, 0.0 }
 0x391   : > { %3018 = vlog2.f32 %v2208_v5  ;;  %v2311_v31 = vadd.f32 %v2310_v1, %v2309_v56 }
 0x392   : > { %v3005_v21 = vpop.eup %3004  ;;  %3020 = vlog2.f32 %v2209_v17 }
 0x393   : > { %v2101_v48 = vpop.xlane.xlu1 %2100  ;;  %v1857_v63 = vpop.xlane.xlu0 %1856  ;;  %3022 = vrcp.f32 %v1855_v40 }
 0x394   : > { %v2179_v18 = vmul.f32 %v3005_v21, %v2101_v48  ;;  %v3007_v0 = vpop.eup %3006  ;;  %3024 = vlog2.f32 %v2210_v23 }
 0x395   : > { %v3009_v47 = vpop.eup %3008  ;;  %v2180_v24 = vmul.f32 %v3007_v0, %v2103_v9 }
 0x396   : > { %v3011_v19 = vpop.eup %3010  ;;  %v2211_v3 = vadd.f32 0.0001, %v2179_v18  ;;  %v2249_v43 = vmul.f32 0.6931472, %v3009_v47 }
 0x397   : > { %v2111_v46 = vpop.xlane.xlu1 %2110  ;;  %v1853_v11 = vpop.xlane.xlu0 %1852  ;;  %v2251_v58 = vmul.f32 0.6931472, %v3011_v19  ;;  %v2212_v20 = vadd.f32 0.0001, %v2180_v24 }
 0x398   : > { %v3013_v13 = vpop.eup %3012  ;;  %3026 = vrcp.f32 %v1853_v11  ;;  %v2312_v50 = vsel %vm2290_vm3, %v2249_v43, 0.0 }
 0x399   : > { %v3015_v14 = vpop.eup %3014  ;;  %3028 = vrcp.f32 %v1857_v63  ;;  %v2181_v29 = vmul.f32 %v3013_v13, %v2105_v6  ;;  %v2314_v9 = vsel %vm2290_vm3, %v2251_v58, 0.0  ;;  %v2313_v25 = vadd.f32 %v2312_v50, %v2311_v31 }
 0x39a   : > { %v3017_v12 = vpop.eup %3016  ;;  %3030 = vlog2.f32 %v2211_v3  ;;  %v2253_v30 = vmul.f32 0.6931472, %v3015_v14 }
 0x39b   : > { %v2107_v42 = vpop.xlane.xlu1 %2106  ;;  %v1863_v22 = vpop.xlane.xlu0 %1862  ;;  %3032 = vlog2.f32 %v2212_v20  ;;  %v2213_v16 = vadd.f32 0.0001, %v2181_v29  ;;  %v2315_v59 = vadd.f32 %v2314_v9, %v2313_v25 }
 0x39c   : > { %v2182_v49 = vmul.f32 %v3017_v12, %v2107_v42  ;;  %v3019_v34 = vpop.eup %3018  ;;  %v2316_v32 = vsel %vm2290_vm3, %v2253_v30, 0.0 }
 0x39d   : > { %v3021_v57 = vpop.eup %3020  ;;  %v2255_v52 = vmul.f32 0.6931472, %v3019_v34  ;;  %v2317_v27 = vadd.f32 %v2316_v32, %v2315_v59 }
 0x39e   : > { %v3023_v39 = vpop.eup %3022  ;;  %v2214_v36 = vadd.f32 0.0001, %v2182_v49  ;;  %v2257_v51 = vmul.f32 0.6931472, %v3021_v57 }
 0x39f   : > { %v2113_v55 = vpop.xlane.xlu1 %2112  ;;  %v1859_v8 = vpop.xlane.xlu0 %1858  ;;  %v2184_v2 = vmul.f32 %v3023_v39, %v2111_v46  ;;  %v2318_v35 = vsel %vm2290_vm3, %v2255_v52, 0.0 }
 0x3a0   : > { %3034 = vrcp.f32 %v1859_v8  ;;  %v3025_v26 = vpop.eup %3024  ;;  %v2319_v61 = vadd.f32 %v2318_v35, %v2317_v27  ;;  %v2320_v17 = vsel %vm2290_vm3, %v2257_v51, 0.0 }
 0x3a1   : > { %3036 = vlog2.f32 %v2213_v16  ;;  %v2259_v28 = vmul.f32 0.6931472, %v3025_v26  ;;  %v2216_v44 = vadd.f32 0.0001, %v2184_v2 }
 0x3a2   : > { %v3027_v4 = vpop.eup %3026  ;;  %3038 = vlog2.f32 %v2214_v36  ;;  %v2321_v48 = vadd.f32 %v2320_v17, %v2319_v61 }
 0x3a3   : > { %v2109_v40 = vpop.xlane.xlu1 %2108  ;;  %v1865_v33 = vpop.xlane.xlu0 %1864  ;;  %3040 = vrcp.f32 %v1863_v22  ;;  %v2322_v21 = vsel %vm2290_vm3, %v2259_v28, 0.0 }
 0x3a4   : > { %v3029_v15 = vpop.eup %3028  ;;  %v2183_v62 = vmul.f32 %v3027_v4, %v2109_v40  ;;  %v2323_v38 = vadd.f32 %v2322_v21, %v2321_v48 }
 0x3a5   : > { %v3031_v37 = vpop.eup %3030  ;;  %v2185_v45 = vmul.f32 %v3029_v15, %v2113_v55 }
 0x3a6   : > { %v2215_v6 = vadd.f32 0.0001, %v2183_v62  ;;  %v2261_v41 = vmul.f32 0.6931472, %v3031_v37  ;;  %v3033_v60 = vpop.eup %3032 }
 0x3a7   : > { %v2115_v5 = vpop.xlane.xlu1 %2114  ;;  %v1861_v10 = vpop.xlane.xlu0 %1860  ;;  %v2217_v63 = vadd.f32 0.0001, %v2185_v45  ;;  %v2263_v53 = vmul.f32 0.6931472, %v3033_v60 }
 0x3a8   : > { %3042 = vlog2.f32 %v2215_v6  ;;  %v2324_v18 = vsel %vm2290_vm3, %v2261_v41, 0.0 }
 0x3a9   : > { %3044 = vrcp.f32 %v1861_v10  ;;  %v2325_v56 = vadd.f32 %v2324_v18, %v2323_v38  ;;  %v2326_v14 = vsel %vm2290_vm3, %v2263_v53, 0.0 }
 0x3aa   : > { %v3035_v7 = vpop.eup %3034  ;;  %3046 = vlog2.f32 %v2216_v44 }
 0x3ab   : > { %v2117_v54 = vpop.xlane.xlu1 %2116  ;;  %v1871_v23 = vpop.xlane.xlu0 %1870  ;;  %v2186_v0 = vmul.f32 %v3035_v7, %v2115_v5  ;;  %v2327_v12 = vadd.f32 %v2326_v14, %v2325_v56 }
 0x3ac   : > { %v3037_v47 = vpop.eup %3036  ;;  %3048 = vrcp.f32 %v1871_v23 }
 0x3ad   : > { %v3039_v19 = vpop.eup %3038  ;;  %3050 = vlog2.f32 %v2217_v63  ;;  %v2218_v3 = vadd.f32 0.0001, %v2186_v0  ;;  %v2265_v1 = vmul.f32 0.6931472, %v3037_v47 }
 0x3ae   : > { %3052 = vrcp.f32 %v1865_v33  ;;  %v3041_v13 = vpop.eup %3040  ;;  %v2267_v43 = vmul.f32 0.6931472, %v3039_v19 }
 0x3af   : > { %v2119_v46 = vpop.xlane.xlu1 %2118  ;;  %v1867_v11 = vpop.xlane.xlu0 %1866  ;;  %v2328_v49 = vsel %vm2290_vm3, %v2265_v1, 0.0 }
 0x3b0   : > { %3054 = vrcp.f32 %v1867_v11  ;;  %v2188_v31 = vmul.f32 %v3041_v13, %v2119_v46  ;;  %v2330_v34 = vsel %vm2290_vm3, %v2267_v43, 0.0  ;;  %v2329_v9 = vadd.f32 %v2328_v49, %v2327_v12 }
 0x3b1   : > { %3056 = vlog2.f32 %v2218_v3 }
 0x3b2   : > { %v3043_v24 = vpop.eup %3042  ;;  %v2220_v25 = vadd.f32 0.0001, %v2188_v31  ;;  %v2331_v52 = vadd.f32 %v2330_v34, %v2329_v9 }
 0x3b3   : > { %v3045_v58 = vpop.eup %3044  ;;  %v2123_v42 = vpop.xlane.xlu1 %2122  ;;  %v2269_v30 = vmul.f32 0.6931472, %v3043_v24 }
 0x3b4   : > { %v1869_v22 = vpop.xlane.xlu0 %1868  ;;  %v2187_v20 = vmul.f32 %v3045_v58, %v2117_v54  ;;  %v3047_v29 = vpop.eup %3046 }
 0x3b5   : > { %3058 = vrcp.f32 %v1869_v22  ;;  %v2332_v57 = vsel %vm2290_vm3, %v2269_v30, 0.0  ;;  %v2271_v39 = vmul.f32 0.6931472, %v3047_v29 }
 0x3b6   : > { %v2219_v50 = vadd.f32 0.0001, %v2187_v20  ;;  %v3049_v8 = vpop.eup %3048  ;;  %v2333_v26 = vadd.f32 %v2332_v57, %v2331_v52 }
 0x3b7   : > { %v2127_v32 = vpop.xlane.xlu1 %2126  ;;  %v3051_v16 = vpop.eup %3050  ;;  %v2334_v2 = vsel %vm2290_vm3, %v2271_v39, 0.0 }
 0x3b8   : > { %v1873_v55 = vpop.xlane.xlu0 %1872  ;;  %3060 = vlog2.f32 %v2219_v50  ;;  %v3053_v59 = vpop.eup %3052  ;;  %v2192_v4 = vmul.f32 %v3049_v8, %v2127_v32  ;;  %v2273_v62 = vmul.f32 0.6931472, %v3051_v16  ;;  %v2335_v28 = vadd.f32 %v2334_v2, %v2333_v26 }
 0x3b9   : > { %3062 = vrcp.f32 %v1873_v55 }
 0x3ba   : > { %v3055_v36 = vpop.eup %3054  ;;  %3064 = vlog2.f32 %v2220_v25  ;;  %v2224_v6 = vadd.f32 0.0001, %v2192_v4  ;;  %v2336_v41 = vsel %vm2290_vm3, %v2273_v62, 0.0 }
 0x3bb   : > { %v2190_v40 = vmul.f32 %v3055_v36, %v2123_v42  ;;  %v3057_v15 = vpop.eup %3056  ;;  %v2337_v17 = vadd.f32 %v2336_v41, %v2335_v28 }
 0x3bc   : > { %v2121_v27 = vpop.xlane.xlu0 %2120  ;;  %v2275_v45 = vmul.f32 0.6931472, %v3057_v15 }
 0x3bd   : > { %v2189_v33 = vmul.f32 %v3053_v59, %v2121_v27  ;;  %v2222_v37 = vadd.f32 0.0001, %v2190_v40 }
 0x3be   : > { %v2338_v48 = vsel %vm2290_vm3, %v2275_v45, 0.0 }
 0x3bf   : > { %v2221_v35 = vadd.f32 0.0001, %v2189_v33  ;;  %v3059_v51 = vpop.eup %3058  ;;  %3066 = vlog2.f32 %v2222_v37  ;;  %v2339_v0 = vadd.f32 %v2338_v48, %v2337_v17 }
 0x3c0   : > { %v2125_v61 = vpop.xlane.xlu0 %2124 }
 0x3c1   : > { %v2191_v5 = vmul.f32 %v3059_v51, %v2125_v61  ;;  %3068 = vlog2.f32 %v2221_v35 }
 0x3c2   : > { %v3061_v10 = vpop.eup %3060  ;;  %3070 = vlog2.f32 %v2224_v6 }
 0x3c3   : > { %v2223_v44 = vadd.f32 0.0001, %v2191_v5  ;;  %v3063_v60 = vpop.eup %3062  ;;  %v2277_v21 = vmul.f32 0.6931472, %v3061_v10 }
 0x3c4   : > { %v2129_v7 = vpop.xlane.xlu0 %2128  ;;  %v3065_v54 = vpop.eup %3064 }
 0x3c5   : > { %3072 = vlog2.f32 %v2223_v44  ;;  %v2193_v63 = vmul.f32 %v3063_v60, %v2129_v7  ;;  %v2340_v23 = vsel %vm2290_vm3, %v2277_v21, 0.0  ;;  %v2279_v38 = vmul.f32 0.6931472, %v3065_v54 }
 0x3c6   : > { %v2341_v47 = vadd.f32 %v2340_v23, %v2339_v0 }
 0x3c7   : > { %v2225_v18 = vadd.f32 0.0001, %v2193_v63  ;;  %v2342_v56 = vsel %vm2290_vm3, %v2279_v38, 0.0 }
 0x3c8   : > { %v2343_v13 = vadd.f32 %v2342_v56, %v2341_v47 }
 0x3c9   : > { %3074 = vlog2.f32 %v2225_v18  ;;  %v3067_v53 = vpop.eup %3066 }
 0x3ca   : > { %v2283_v3 = vmul.f32 0.6931472, %v3067_v53 }
 0x3cb   : > { %v3069_v19 = vpop.eup %3068 }
 0x3cc   : > { %v2281_v46 = vmul.f32 0.6931472, %v3069_v19  ;;  %v3071_v11 = vpop.eup %3070  ;;  %v2346_v58 = vsel %vm2290_vm3, %v2283_v3, 0.0 }
 0x3cd   : > { %v2287_v12 = vmul.f32 0.6931472, %v3071_v11 }
 0x3ce   : > { %v2344_v14 = vsel %vm2290_vm3, %v2281_v46, 0.0 }
 0x3cf   : > { %v3073_v24 = vpop.eup %3072  ;;  %v2345_v1 = vadd.f32 %v2344_v14, %v2343_v13  ;;  %v2350_v29 = vsel %vm2290_vm3, %v2287_v12, 0.0 }
 0x3d0   : > { %v2285_v43 = vmul.f32 0.6931472, %v3073_v24 }
 0x3d1   : > { %v2347_v31 = vadd.f32 %v2346_v58, %v2345_v1 }
 0x3d2   : > { %v2348_v42 = vsel %vm2290_vm3, %v2285_v43, 0.0 }
 0x3d3   : > { %v3075_v22 = vpop.eup %3074  ;;  %v2349_v30 = vadd.f32 %v2348_v42, %v2347_v31 }
 0x3d4   : > { %v2289_v20 = vmul.f32 0.6931472, %v3075_v22 }
 0x3d5   : > { %v2351_v49 = vadd.f32 %v2350_v29, %v2349_v30 }
 0x3d6   : > { %v2352_v34 = vsel %vm2290_vm3, %v2289_v20, 0.0 }
 0x3d7   : > { %v2353_v50 = vadd.f32 %v2352_v34, %v2351_v49 }
 0x3d9   : > { %2354 = vadd.xlane.f32.xlu1 %v2353_v50 }
 0x466   : > { %v2355_v9 = vpop.xlane.xlu1 %2354 }
 0x467   : > { %v2356_v25 = vrot.slane %v2355_v9, 4 }
 0x469   : > { %v2357_v55 = vadd.f32 %v2356_v25, %v2355_v9 }
 0x46b   : > { %v2358_v8 = vrot.slane %v2357_v55, 2 }
 0x46d   : > { %v2359_v57 = vadd.f32 %v2358_v8, %v2357_v55 }
 0x46f   : > { %v2360_v32 = vrot.slane %v2359_v57, 1 }
 0x471   : > { %v2361_v16 = vadd.f32 %v2360_v32, %v2359_v57 }
 0x473   : > { %2849 = vpush %v2361_v16 }
 0x4a4   : > { %s2850_s29 = spop %2849 }
 0x4a5   : > { %s2363_s15 = ssub.f32 0.0, %s2850_s29 }
 0x4a7   : > { %v2364_v39 = vstv %s2363_s15 }
 0x4a8   : > { %2365 = vst [vmem:[%s425_s12] sm:$0xff] %v2364_v39 }
 0x4a9 PF: > { %s20_s13 = sadd.s32 1, %s3082_s13  }
 0x4aa   : > { %p17_p5 = scmp.ge.s32.totalorder %s20_s13, 4  }
 0x4ac   :  { %19 = sbr.rel (!%p17_p5) target bundleno = 1 (0x1), region = 99 }

</bundles_post_ra>
